<compile_context>
chip_gen: v6e
topology: v6e:2x2x1
jax: 0.10.0
libtpu: 0.0.40
codegen_flags: <defaults>
</compile_context>

<pallas_src>
import functools
import math

import jax
import jax.numpy as jnp
from jax.experimental import pallas as pl
from jax.experimental.pallas import tpu as pltpu

K = 30                            # feature dim fixed by augmentationDotProduct
SAMPLES_PER_ROW = 128             # samples packed into one lane-dense row
ROW_WIDTH = SAMPLES_PER_ROW * K   # 3840 = 30 * 128


def _packed_dot_kernel(x_ref, w_ref, o_ref, *, compute_dtype):
    # x_ref: (TM, 3840) packed samples in x's native dtype.
    # w_ref: (3840, 128) block-diagonal weights in compute_dtype.
    # o_ref: (TM, 128) lane-dense results in x's dtype.
    x = x_ref[...]
    if x.dtype != compute_dtype:
        # In-VMEM cast (VPU work, hidden under the tile DMA) -- used for the
        # optional bf16 fast path on f32 inputs.
        x = x.astype(compute_dtype)
    o_ref[...] = jnp.dot(
        x, w_ref[...], preferred_element_type=jnp.float32
    ).astype(o_ref.dtype)


def _make_block_weights(weights, dtype):
    # (3840, 128): column j holds w in rows 30*j .. 30*j + 29, zeros elsewhere.
    w = weights.astype(jnp.float32).reshape(K, 1)
    return jnp.kron(jnp.eye(SAMPLES_PER_ROW, dtype=jnp.float32), w).astype(dtype)


def _round_up(v, m):
    return ((v + m - 1) // m) * m


def _default_tile_and_vmem():
    # Conservative defaults valid on v5e / v6e / v7x (>= 64 MiB physical VMEM):
    #   1024-row f32 tile = 15 MiB, double-buffered x + weights + out ~ 35 MiB.
    tm_rows, vmem_limit = 1024, 48 << 20
    try:
        info = pltpu.get_tpu_info()
        cap = None
        for name in ("vmem_capacity_bytes", "vmem_size_bytes", "vmem_bytes"):
            cap = getattr(info, name, None)
            if cap:
                break
        if cap and cap >= (96 << 20):        # 128 MiB parts (v5e / v6e)
            tm_rows, vmem_limit = 2048, 80 << 20
    except Exception:
        pass                                  # fall back to the safe defaults
    return tm_rows, vmem_limit


def augmentation_ensemble_net(x, weights, *, tm_rows=None, vmem_limit_bytes=None,
                              use_bf16=False):
    """Equivalent of augmentationEnsembleNet.forward: matmul(x, weights[30])."""
    assert x.shape[-1] == K, f"last dim must be {K}, got {x.shape}"
    assert weights.shape == (K,), f"weights must be ({K},), got {weights.shape}"

    lead = x.shape[:-1]
    M = 1
    for d in lead:
        M *= d

    out_dtype = x.dtype
    compute_dtype = jnp.bfloat16 if use_bf16 else x.dtype

    x2d = x.reshape(M, K)                        # free (row-major view)
    M_full = (M // SAMPLES_PER_ROW) * SAMPLES_PER_ROW
    rem = M - M_full

    pieces = []

    if M_full > 0:
        m_packed = M_full // SAMPLES_PER_ROW
        # Slice only when a <128-sample tail exists; when M is 128-aligned the
        # packed view below is a zero-cost reshape of x (no extra HBM pass).
        x_main = x2d if rem == 0 else x2d[:M_full]
        x_packed = x_main.reshape(m_packed, ROW_WIDTH)

        d_tm, d_vmem = _default_tile_and_vmem()
        tm_rows_eff = tm_rows if tm_rows is not None else d_tm
        vmem_limit = vmem_limit_bytes if vmem_limit_bytes is not None else d_vmem

        if m_packed <= 8:
            tm = m_packed                        # single full-dim block
        else:
            # >= 2 grid steps so both v7x TensorCores get work; rows stay
            # sublane-aligned (multiple of 8) for the (8,128) constraint.
            tm = min(tm_rows_eff, _round_up(pl.cdiv(m_packed, 2), 8))
        grid = (pl.cdiv(m_packed, tm),)          # last block may be partial

        w_block = _make_block_weights(weights, compute_dtype)
        kernel = functools.partial(_packed_dot_kernel, compute_dtype=compute_dtype)

        y_main = pl.pallas_call(
            kernel,
            out_shape=jax.ShapeDtypeStruct((m_packed, SAMPLES_PER_ROW), out_dtype),
            grid_spec=pltpu.PrefetchScalarGridSpec(
                num_scalar_prefetch=0,
                grid=grid,
                in_specs=[
                    pl.BlockSpec((tm, ROW_WIDTH), lambda i: (i, 0)),
                    # constant block index -> weights stay resident across steps
                    pl.BlockSpec((ROW_WIDTH, SAMPLES_PER_ROW), lambda i: (0, 0)),
                ],
                out_specs=pl.BlockSpec((tm, SAMPLES_PER_ROW), lambda i: (i, 0)),
            ),
            compiler_params=pltpu.CompilerParams(
                dimension_semantics=("parallel",),   # megacore sharding on v7x
                vmem_limit_bytes=vmem_limit,
            ),
            cost_estimate=pl.CostEstimate(
                # FLOPs actually executed by the dense block-diagonal matmul.
                flops=2 * m_packed * ROW_WIDTH * SAMPLES_PER_ROW,
                transcendentals=0,
                bytes_accessed=(
                    m_packed * ROW_WIDTH * x.dtype.itemsize
                    + ROW_WIDTH * SAMPLES_PER_ROW * w_block.dtype.itemsize
                    + m_packed * SAMPLES_PER_ROW * out_dtype.itemsize
                ),
            ),
        )(x_packed, w_block)
        pieces.append(y_main.reshape(M_full))

    if rem > 0:
        # Tiny (< 128 sample) remainder: plain jnp dot instead of padding all of x.
        x_tail = x2d[M_full:].astype(jnp.float32)
        y_tail = (x_tail @ weights.astype(jnp.float32)).astype(out_dtype)
        pieces.append(y_tail)

    y = pieces[0] if len(pieces) == 1 else jnp.concatenate(pieces)
    return y.reshape(lead)


if __name__ == "__main__":
    key = jax.random.PRNGKey(0)
    k_w, k1, k2, k3 = jax.random.split(key, 4)

    # Deterministic parameter init mirroring: torch.randn(30) / sqrt(30)
    weights = jax.random.normal(k_w, (K,), dtype=jnp.float32) / math.sqrt(K)

    # (1) 128-sample-aligned small input (2, 64, 30): free packed reshape,
    #     single packed row, single grid step.
    x1 = jax.random.normal(k1, (2, 64, K), dtype=jnp.float32)
    y1 = jax.block_until_ready(augmentation_ensemble_net(x1, weights))
    y1_ref = jnp.sum(x1 * weights, axis=-1)
    assert y1.shape == y1_ref.shape == (2, 64), (y1.shape,)
    assert y1.dtype == x1.dtype
    assert jnp.allclose(y1, y1_ref, atol=1e-5, rtol=1e-5), "aligned f32 mismatch"

    # (2) Unaligned input (2, 1000, 30): M=2000 -> 2-step grid with a partial
    #     final block plus an 80-sample jnp tail.
    x2 = jax.random.normal(k2, (2, 1000, K), dtype=jnp.float32)
    y2 = jax.block_until_ready(augmentation_ensemble_net(x2, weights))
    y2_ref = jnp.sum(x2 * weights, axis=-1)
    assert y2.shape == y2_ref.shape == (2, 1000), (y2.shape,)
    assert jnp.allclose(y2, y2_ref, atol=1e-5, rtol=1e-5), "unaligned f32 mismatch"

    # (3) Tiny input (< 128 samples): pure jnp fallback path.
    x3 = jax.random.normal(k3, (2, 8, K), dtype=jnp.float32)
    y3 = jax.block_until_ready(augmentation_ensemble_net(x3, weights))
    assert jnp.allclose(y3, jnp.sum(x3 * weights, axis=-1), atol=1e-5, rtol=1e-5)

    # (4) bf16 fast paths (looser tolerance by design: bf16 operands, f32 acc).
    y1_bf = jax.block_until_ready(
        augmentation_ensemble_net(x1, weights, use_bf16=True))
    assert jnp.allclose(y1_bf, y1_ref, atol=5e-2, rtol=5e-2), "bf16-flag mismatch"

    x2_bf = x2.astype(jnp.bfloat16)            # native bf16 consumption / output
    y2_bf = jax.block_until_ready(augmentation_ensemble_net(x2_bf, weights))
    assert y2_bf.dtype == jnp.bfloat16
    y2_bf_ref = jnp.sum(x2_bf.astype(jnp.float32) * weights, axis=-1)
    assert jnp.allclose(y2_bf.astype(jnp.float32), y2_bf_ref,
                        atol=6e-2, rtol=5e-2), "bf16-native mismatch"

    print("KERNEL_OK")
</pallas_src>

<mosaic_0001>
module attributes {stable_mosaic.version = 11 : i64} {
  func.func @_packed_dot_kernel(%arg0: i32, %arg1: memref<1x3840xf32, #tpu.memory_space<vmem>>, %arg2: memref<3840x128xf32, #tpu.memory_space<vmem>>, %arg3: memref<1x128xf32, #tpu.memory_space<vmem>>) attributes {dimension_semantics = [#tpu.dimension_semantics<parallel>], iteration_bounds = array<i64: 1>, scalar_prefetch = 0 : i64, scratch_operands = 0 : i64, tpu.core_type = #tpu.core_type<tc>, window_params = [{transform_indices = @transform_0, window_bounds = array<i64: 1, 3840>}, {pipeline_mode = #tpu.pipeline_mode<synchronous>, transform_indices = @transform_1, window_bounds = array<i64: 3840, 128>}, {transform_indices = @transform_2, window_bounds = array<i64: 1, 128>}]} {
    %c0 = arith.constant 0 : index
    %c0_0 = arith.constant 0 : index
    %0 = vector.load %arg1[%c0, %c0_0] : memref<1x3840xf32, #tpu.memory_space<vmem>>, vector<1x3840xf32>
    %c0_1 = arith.constant 0 : index
    %c0_2 = arith.constant 0 : index
    %1 = vector.load %arg2[%c0_1, %c0_2] : memref<3840x128xf32, #tpu.memory_space<vmem>>, vector<3840x128xf32>
    %cst = arith.constant dense<0.000000e+00> : vector<1x128xf32>
    %2 = tpu.matmul %0, %1, %cst {dimension_numbers = #tpu.dot_dimension_numbers<[1], [0], [0], [1], [0, 0, 1, 1], [], []>} : vector<1x3840xf32>, vector<3840x128xf32>, vector<1x128xf32> -> vector<1x128xf32>
    %c0_3 = arith.constant 0 : index
    %c0_4 = arith.constant 0 : index
    %3 = vector.load %arg3[%c0_3, %c0_4] : memref<1x128xf32, #tpu.memory_space<vmem>>, vector<1x128xf32>
    tpu.vector_store %arg3[%c0_3, %c0_4], %2 {strides = array<i32>} : memref<1x128xf32, #tpu.memory_space<vmem>>, vector<1x128xf32>,
    return
  }
  func.func @transform_0(%arg0: i32) -> (i32, i32) {
    %c0_i32 = arith.constant 0 : i32
    %c0_i32_0 = arith.constant 0 : i32
    return %arg0, %c0_i32 : i32, i32
  }
  func.func @transform_1(%arg0: i32) -> (i32, i32) {
    %c0_i32 = arith.constant 0 : i32
    %c0_i32_0 = arith.constant 0 : i32
    %c0_i32_1 = arith.constant 0 : i32
    return %c0_i32, %c0_i32_0 : i32, i32
  }
  func.func @transform_2(%arg0: i32) -> (i32, i32) {
    %c0_i32 = arith.constant 0 : i32
    %c0_i32_0 = arith.constant 0 : i32
    return %arg0, %c0_i32 : i32, i32
  }
}

</mosaic_0001>

<bundles_post_ra>
// kernel: tpu_custom_call.1
= control target key start
LH: loop header
LB: loop body
LE: loop exit
PB: predicated region body
PF: predicated region fallthrough
CT: control target
= control target key end

     0   :  { %7 = vsyncpa [#allocation3], 0  ;;  %s2462_s0 = inlined_call_operand.hbm [shape: f32[1,3840], index: 0, kind: input, shape index: {}]   ;;  %s2463_s1 = inlined_call_operand.hbm [shape: f32[3840,128], index: 1, kind: input, shape index: {}]   ;;  %s2464_s2 = inlined_call_operand.hbm [shape: f32[1,128], index: 2, kind: output, shape index: {}]  }
   0x1   :  { %8 = vsyncpa [#allocation6], 0 }
   0x2   :  { %9 = vsyncpa [#allocation4], 0  ;;  %s2339_s9 = smov [#allocation2]   ;;  %s2340_s11 = smov [#allocation5]  }
   0x3   :  { %s16_s10 = sshll.u32 %s2339_s9, 4  ;;  %s25_s12 = sshll.u32 %s2340_s11, 4  ;;  %s17_s10 = int_to_ptr.vmem [resolvable:$true] %s16_s10  ;;  %s26_s12 = int_to_ptr.vmem [resolvable:$true] %s25_s12 }
   0x4   :  { %s2281_s13 = scalar_lea.vmem %s17_s10, 480  ;;  %p2286_p1 = scmp.lt.s32.totalorder %s17_s10, %s17_s10 }
   0x5   :  { %p2282_p0 = scmp.ne.s32.totalorder %s17_s10, %s2281_s13  ;;  %p2287_p2 = scmp.lt.s32.totalorder %s2281_s13, %s2281_s13 }
   0x7   :  { %p2288_p3 = por %p2287_p2, %p2286_p1 }
   0x9   :  { %p2289_p4 = pnand %p2288_p3, %p2282_p0 }
   0xb   :  { %2292 = shalt.err (!%p2289_p4)
}
   0xc   :  { %19 = dma.hbm_to_vmem [thread:$0]  %s2462_s0, 480, %s17_s10, [#allocation3]  }
   0xd   :  { %s2301_s16 = scalar_lea.vmem %s26_s12, 61440  ;;  %p2306_p6 = scmp.lt.s32.totalorder %s26_s12, %s26_s12 }
   0xe   :  { %p2302_p5 = scmp.ne.s32.totalorder %s26_s12, %s2301_s16  ;;  %p2307_p7 = scmp.lt.s32.totalorder %s2301_s16, %s2301_s16 }
  0x10   :  { %p2308_p8 = por %p2307_p7, %p2306_p6 }
  0x12   :  { %p2309_p9 = pnand %p2308_p8, %p2302_p5 }
  0x14   :  { %2312 = shalt.err (!%p2309_p9)
}
  0x15   :  { %s2341_s17 = smov 128   ;;  %s2342_s18 = smov 8  }
  0x16   :  { %31 = dma.hbm_to_vmem [thread:$0]  %s2463_s1, 61440, %s26_s12, [#allocation6], %s2341_s17, %s2341_s17, %s2342_s18  }
  0x17   :  { %2333 = dma.done.wait [#allocation3], 480  }
  0x18   :  { %2334 = vsyncadd [#allocation3], 4294966816 }
  0x19   :  { %2335 = dma.done.wait [#allocation6], 61440  }
  0x1a   :  { %2336 = vsyncadd [#allocation6], 4294905856  ;;  %v73_v0 = vld [vmem:[#allocation5 + $0xf8] sm:$0xff]  ;;  %v72_v4 = vld [vmem:[#allocation5 + $0xf0] sm:$0xff]  ;;  %v526_v38 = vlaneseq  ;;  %s2343_s0 = smov [#allocation7]  }
  0x1b   :  { %v105_v1 = vld [vmem:[#allocation5 + $0x1f8] sm:$0xff]  ;;  %1743 = vmatprep.subr.mxu0 %v73_v0  ;;  %v104_v5 = vld [vmem:[#allocation5 + $0x1f0] sm:$0xff]  ;;  %v71_v8 = vld [vmem:[#allocation5 + $0xe8] sm:$0xff]  ;;  %s1733_s1 = sshll.u32 %s2343_s0, 4  ;;  %s1734_s1 = int_to_ptr.vmem [resolvable:$true] %s1733_s1 }
  0x1c   :  { %v57_v2 = vld [vmem:[#allocation5 + $0x78] sm:$0xff]  ;;  %1778 = vmatprep.subr.mxu1 %v105_v1  ;;  %v56_v6 = vld [vmem:[#allocation5 + $0x70] sm:$0xff]  ;;  %v103_v9 = vld [vmem:[#allocation5 + $0x1e8] sm:$0xff]  ;;  %v2365_v47 = vshrl.u32 %v526_v38, 7  ;;  %s2313_s21 = scalar_lea.vmem %s1734_s1, 16  ;;  %s2317_s22 = scalar_lea.vmem %s1734_s1, 32 }
  0x1d   :  { %v89_v3 = vld [vmem:[#allocation5 + $0x178] sm:$0xff]  ;;  %1744 = vmatpush3.msra.mxu0 %v57_v2  ;;  %v88_v7 = vld [vmem:[#allocation5 + $0x170] sm:$0xff]  ;;  %v55_v10 = vld [vmem:[#allocation5 + $0x68] sm:$0xff]  ;;  %p2314_p10 = scmp.ne.s32.totalorder %s1734_s1, %s2313_s21  ;;  %p2318_p11 = scmp.lt.s32.totalorder %s1734_s1, %s1734_s1 }
  0x1e   :  { %1779 = vmatpush3.msra.mxu1 %v89_v3  ;;  %1745 = vmatprep.subr.mxu0 %v72_v4  ;;  %v87_v11 = vld [vmem:[#allocation5 + $0x168] sm:$0xff]  ;;  %v70_v12 = vld [vmem:[#allocation5 + $0xe0] sm:$0xff]  ;;  %v69_v16 = vld [vmem:[#allocation5 + $0xd8] sm:$0xff]  ;;  %v2368_v56 = vsub.s32 1, %v2365_v47  ;;  %v2373_v60 = vsub.s32 3, %v2365_v47  ;;  %v2376_v63 = vsub.s32 0, %v2365_v47  ;;  %p2319_p12 = scmp.lt.s32.totalorder %s2317_s22, %s2313_s21 }
  0x1f   :  { %1780 = vmatprep.subr.mxu1 %v104_v5  ;;  %1746 = vmatpush3.msra.mxu0 %v56_v6  ;;  %v102_v13 = vld [vmem:[#allocation5 + $0x1e0] sm:$0xff]  ;;  %v101_v17 = vld [vmem:[#allocation5 + $0x1d8] sm:$0xff]  ;;  %v68_v20 = vld [vmem:[#allocation5 + $0xd0] sm:$0xff]  ;;  %v2379_v0 = vsub.s32 2, %v2365_v47 }
  0x20   :  { %1781 = vmatpush3.msra.mxu1 %v88_v7  ;;  %1747 = vmatprep.subr.mxu0 %v71_v8  ;;  %v54_v14 = vld [vmem:[#allocation5 + $0x60] sm:$0xff]  ;;  %v53_v18 = vld [vmem:[#allocation5 + $0x58] sm:$0xff]  ;;  %v100_v21 = vld [vmem:[#allocation5 + $0x1d0] sm:$0xff]  ;;  %p2320_p13 = por %p2319_p12, %p2318_p11 }
  0x21   :  { %1782 = vmatprep.subr.mxu1 %v103_v9  ;;  %v86_v15 = vld [vmem:[#allocation5 + $0x160] sm:$0xff]  ;;  %1748 = vmatpush3.msra.mxu0 %v55_v10  ;;  %v85_v19 = vld [vmem:[#allocation5 + $0x158] sm:$0xff]  ;;  %v52_v22 = vld [vmem:[#allocation5 + $0x50] sm:$0xff] }
  0x22   :  { %1783 = vmatpush3.msra.mxu1 %v87_v11  ;;  %1749 = vmatprep.subr.mxu0 %v70_v12  ;;  %v84_v23 = vld [vmem:[#allocation5 + $0x150] sm:$0xff]  ;;  %v67_v24 = vld [vmem:[#allocation5 + $0xc8] sm:$0xff]  ;;  %v66_v28 = vld [vmem:[#allocation5 + $0xc0] sm:$0xff]  ;;  %p2321_p0 = pnand %p2320_p13, %p2314_p10 }
  0x23   :  { %1784 = vmatprep.subr.mxu1 %v102_v13  ;;  %1750 = vmatpush3.msra.mxu0 %v54_v14  ;;  %v99_v25 = vld [vmem:[#allocation5 + $0x1c8] sm:$0xff]  ;;  %v98_v29 = vld [vmem:[#allocation5 + $0x1c0] sm:$0xff]  ;;  %v65_v32 = vld [vmem:[#allocation5 + $0xb8] sm:$0xff] }
  0x24   :  { %1785 = vmatpush3.msra.mxu1 %v86_v15  ;;  %1751 = vmatprep.subr.mxu0 %v69_v16  ;;  %v51_v26 = vld [vmem:[#allocation5 + $0x48] sm:$0xff]  ;;  %v50_v30 = vld [vmem:[#allocation5 + $0x40] sm:$0xff]  ;;  %v97_v33 = vld [vmem:[#allocation5 + $0x1b8] sm:$0xff] }
  0x25   :  { %1786 = vmatprep.subr.mxu1 %v101_v17  ;;  %1752 = vmatpush3.msra.mxu0 %v53_v18  ;;  %v83_v27 = vld [vmem:[#allocation5 + $0x148] sm:$0xff]  ;;  %v82_v31 = vld [vmem:[#allocation5 + $0x140] sm:$0xff]  ;;  %v49_v34 = vld [vmem:[#allocation5 + $0x38] sm:$0xff] }
  0x26   :  { %1787 = vmatpush3.msra.mxu1 %v85_v19  ;;  %1753 = vmatprep.subr.mxu0 %v68_v20  ;;  %v81_v35 = vld [vmem:[#allocation5 + $0x138] sm:$0xff]  ;;  %v64_v36 = vld [vmem:[#allocation5 + $0xb0] sm:$0xff]  ;;  %v63_v41 = vld [vmem:[#allocation5 + $0xa8] sm:$0xff] }
  0x27   :  { %1788 = vmatprep.subr.mxu1 %v100_v21  ;;  %1754 = vmatpush3.msra.mxu0 %v52_v22  ;;  %v96_v37 = vld [vmem:[#allocation5 + $0x1b0] sm:$0xff]  ;;  %v95_v42 = vld [vmem:[#allocation5 + $0x1a8] sm:$0xff]  ;;  %v62_v45 = vld [vmem:[#allocation5 + $0xa0] sm:$0xff] }
  0x28   :  { %1789 = vmatpush3.msra.mxu1 %v84_v23  ;;  %1755 = vmatprep.subr.mxu0 %v67_v24  ;;  %v48_v39 = vld [vmem:[#allocation5 + $0x30] sm:$0xff]  ;;  %v47_v43 = vld [vmem:[#allocation5 + $0x28] sm:$0xff]  ;;  %v94_v46 = vld [vmem:[#allocation5 + $0x1a0] sm:$0xff] }
  0x29   :  { %1790 = vmatprep.subr.mxu1 %v99_v25  ;;  %1756 = vmatpush3.msra.mxu0 %v51_v26  ;;  %v80_v40 = vld [vmem:[#allocation5 + $0x130] sm:$0xff]  ;;  %v79_v44 = vld [vmem:[#allocation5 + $0x128] sm:$0xff]  ;;  %v46_v48 = vld [vmem:[#allocation5 + $0x20] sm:$0xff] }
  0x2a   :  { %1791 = vmatpush3.msra.mxu1 %v83_v27  ;;  %1757 = vmatprep.subr.mxu0 %v66_v28  ;;  %v78_v49 = vld [vmem:[#allocation5 + $0x120] sm:$0xff]  ;;  %v61_v50 = vld [vmem:[#allocation5 + $0x98] sm:$0xff]  ;;  %v60_v54 = vld [vmem:[#allocation5 + $0x90] sm:$0xff] }
  0x2b   :  { %1792 = vmatprep.subr.mxu1 %v98_v29  ;;  %1758 = vmatpush3.msra.mxu0 %v50_v30  ;;  %v93_v51 = vld [vmem:[#allocation5 + $0x198] sm:$0xff]  ;;  %v92_v55 = vld [vmem:[#allocation5 + $0x190] sm:$0xff]  ;;  %v2370_v59 = vld [vmem:[#allocation2] sm:$0xff] }
  0x2c   :  { %1793 = vmatpush3.msra.mxu1 %v82_v31  ;;  %1759 = vmatprep.subr.mxu0 %v65_v32  ;;  %v45_v52 = vld [vmem:[#allocation5 + $0x18] sm:$0xff]  ;;  %v44_v57 = vld [vmem:[#allocation5 + $0x10] sm:$0xff]  ;;  %v59_v61 = vld [vmem:[#allocation5 + $0x88] sm:$0xff]  ;;  %v533_v5 = vrot.slane %v2370_v59, %v2368_v56  ;;  %v541_v7 = vrot.slane %v2370_v59, %v2373_v60  ;;  %v529_v9 = vrot.slane %v2370_v59, %v2376_v63 }
  0x2d   :  { %1794 = vmatprep.subr.mxu1 %v97_v33  ;;  %1760 = vmatpush3.msra.mxu0 %v49_v34  ;;  %v77_v53 = vld [vmem:[#allocation5 + $0x118] sm:$0xff]  ;;  %v76_v58 = vld [vmem:[#allocation5 + $0x110] sm:$0xff]  ;;  %v91_v62 = vld [vmem:[#allocation5 + $0x188] sm:$0xff]  ;;  %v537_v10 = vrot.slane %v2370_v59, %v2379_v0 }
  0x2e   :  { %1795 = vmatpush3.msra.mxu1 %v81_v35  ;;  %1761 = vmatprep.subr.mxu0 %v64_v36  ;;  %v43_v1 = vld [vmem:[#allocation5 + $0x8] sm:$0xff]  ;;  %v58_v3 = vld [vmem:[#allocation5 + $0x80] sm:$0xff]  ;;  %v137_v11 = vld [vmem:[#allocation5 + $0x2f8] sm:$0xff] }
  0x2f   :  { %1796 = vmatprep.subr.mxu1 %v96_v37  ;;  %1762 = vmatpush3.msra.mxu0 %v48_v39  ;;  %v75_v2 = vld [vmem:[#allocation5 + $0x108] sm:$0xff]  ;;  %v90_v4 = vld [vmem:[#allocation5 + $0x180] sm:$0xff]  ;;  %v169_v12 = vld [vmem:[#allocation5 + $0x3f8] sm:$0xff] }
  0x30   :  { %1797 = vmatpush3.msra.mxu1 %v80_v40  ;;  %1763 = vmatprep.subr.mxu0 %v63_v41  ;;  %v42_v6 = vld [vmem:[#allocation5] sm:$0xff]  ;;  %v121_v13 = vld [vmem:[#allocation5 + $0x278] sm:$0xff]  ;;  %v136_v15 = vld [vmem:[#allocation5 + $0x2f0] sm:$0xff] }
  0x31   :  { %1798 = vmatprep.subr.mxu1 %v95_v42  ;;  %1764 = vmatpush3.msra.mxu0 %v47_v43  ;;  %v74_v8 = vld [vmem:[#allocation5 + $0x100] sm:$0xff]  ;;  %v153_v14 = vld [vmem:[#allocation5 + $0x378] sm:$0xff]  ;;  %v168_v16 = vld [vmem:[#allocation5 + $0x3f0] sm:$0xff] }
  0x32   :  { %1799 = vmatpush3.msra.mxu1 %v79_v44  ;;  %1765 = vmatprep.subr.mxu0 %v62_v45  ;;  %v120_v17 = vld [vmem:[#allocation5 + $0x270] sm:$0xff]  ;;  %v135_v19 = vld [vmem:[#allocation5 + $0x2e8] sm:$0xff]  ;;  %v134_v23 = vld [vmem:[#allocation5 + $0x2e0] sm:$0xff] }
  0x33   :  { %1800 = vmatprep.subr.mxu1 %v94_v46  ;;  %1766 = vmatpush3.msra.mxu0 %v46_v48  ;;  %v152_v18 = vld [vmem:[#allocation5 + $0x370] sm:$0xff]  ;;  %v167_v20 = vld [vmem:[#allocation5 + $0x3e8] sm:$0xff]  ;;  %v166_v24 = vld [vmem:[#allocation5 + $0x3e0] sm:$0xff] }
  0x34   :  { %1801 = vmatpush3.msra.mxu1 %v78_v49  ;;  %1767 = vmatprep.subr.mxu0 %v61_v50  ;;  %v119_v21 = vld [vmem:[#allocation5 + $0x268] sm:$0xff]  ;;  %v118_v25 = vld [vmem:[#allocation5 + $0x260] sm:$0xff]  ;;  %v133_v27 = vld [vmem:[#allocation5 + $0x2d8] sm:$0xff] }
  0x35   :  { %1802 = vmatprep.subr.mxu1 %v93_v51  ;;  %1768 = vmatpush3.msra.mxu0 %v45_v52  ;;  %v151_v22 = vld [vmem:[#allocation5 + $0x368] sm:$0xff]  ;;  %v150_v26 = vld [vmem:[#allocation5 + $0x360] sm:$0xff]  ;;  %v165_v28 = vld [vmem:[#allocation5 + $0x3d8] sm:$0xff] }
  0x36   :  { %1803 = vmatpush3.msra.mxu1 %v77_v53  ;;  %1769 = vmatprep.subr.mxu0 %v60_v54  ;;  %v117_v29 = vld [vmem:[#allocation5 + $0x258] sm:$0xff]  ;;  %v132_v31 = vld [vmem:[#allocation5 + $0x2d0] sm:$0xff]  ;;  %v131_v35 = vld [vmem:[#allocation5 + $0x2c8] sm:$0xff] }
  0x37   :  { %1804 = vmatprep.subr.mxu1 %v92_v55  ;;  %1770 = vmatpush3.msra.mxu0 %v44_v57  ;;  %v149_v30 = vld [vmem:[#allocation5 + $0x358] sm:$0xff]  ;;  %v164_v32 = vld [vmem:[#allocation5 + $0x3d0] sm:$0xff]  ;;  %v163_v36 = vld [vmem:[#allocation5 + $0x3c8] sm:$0xff] }
  0x38   :  { %1805 = vmatpush3.msra.mxu1 %v76_v58  ;;  %1771 = vmatprep.subr.mxu0 %v59_v61  ;;  %v116_v33 = vld [vmem:[#allocation5 + $0x250] sm:$0xff]  ;;  %v115_v37 = vld [vmem:[#allocation5 + $0x248] sm:$0xff]  ;;  %v130_v39 = vld [vmem:[#allocation5 + $0x2c0] sm:$0xff] }
  0x39   :  { %1806 = vmatprep.subr.mxu1 %v91_v62  ;;  %1772 = vmatpush3.msra.mxu0 %v43_v1  ;;  %v148_v34 = vld [vmem:[#allocation5 + $0x350] sm:$0xff]  ;;  %v147_v38 = vld [vmem:[#allocation5 + $0x348] sm:$0xff]  ;;  %v162_v40 = vld [vmem:[#allocation5 + $0x3c0] sm:$0xff] }
  0x3a   :  { %1807 = vmatpush3.msra.mxu1 %v75_v2  ;;  %1773 = vmatprep.subr.mxu0 %v58_v3  ;;  %v114_v41 = vld [vmem:[#allocation5 + $0x240] sm:$0xff]  ;;  %v129_v43 = vld [vmem:[#allocation5 + $0x2b8] sm:$0xff]  ;;  %v128_v48 = vld [vmem:[#allocation5 + $0x2b0] sm:$0xff]  ;;  %v2390_v3 = vsub.s32 5, %v2365_v47 }
  0x3b   :  { %1808 = vmatprep.subr.mxu1 %v90_v4  ;;  %1774 = vmatpush3.msra.mxu0 %v42_v6  ;;  %v146_v42 = vld [vmem:[#allocation5 + $0x340] sm:$0xff]  ;;  %v161_v44 = vld [vmem:[#allocation5 + $0x3b8] sm:$0xff]  ;;  %v160_v49 = vld [vmem:[#allocation5 + $0x3b0] sm:$0xff] }
  0x3c   :  { %740 = vmatprep.mubr.f32.mxu0 %v533_v5  ;;  %1809 = vmatpush3.msra.mxu1 %v74_v8  ;;  %v113_v45 = vld [vmem:[#allocation5 + $0x238] sm:$0xff]  ;;  %v112_v50 = vld [vmem:[#allocation5 + $0x230] sm:$0xff]  ;;  %v127_v52 = vld [vmem:[#allocation5 + $0x2a8] sm:$0xff] }
  0x3d   :  { %810 = vmatprep.mubr.f32.mxu1 %v541_v7  ;;  %741 = vmatmul.mubr.f32.vlgmr.msra.gmra.mxu0 %v529_v9  ;;  %v145_v46 = vld [vmem:[#allocation5 + $0x338] sm:$0xff]  ;;  %v144_v51 = vld [vmem:[#allocation5 + $0x330] sm:$0xff]  ;;  %v159_v53 = vld [vmem:[#allocation5 + $0x3a8] sm:$0xff] }
  0x3e   :  { %811 = vmatmul.mubr.f32.vlgmr.msra.gmra.mxu1 %v537_v10  ;;  %1813 = vmatprep.subr.mxu0 %v137_v11  ;;  %v111_v54 = vld [vmem:[#allocation5 + $0x228] sm:$0xff]  ;;  %v126_v57 = vld [vmem:[#allocation5 + $0x2a0] sm:$0xff]  ;;  %v125_v1 = vld [vmem:[#allocation5 + $0x298] sm:$0xff]  ;;  %v2393_v10 = vsub.s32 4, %v2365_v47 }
  0x3f   :  { %1848 = vmatprep.subr.mxu1 %v169_v12  ;;  %1814 = vmatpush3.msra.mxu0 %v121_v13  ;;  %v143_v55 = vld [vmem:[#allocation5 + $0x328] sm:$0xff]  ;;  %v158_v58 = vld [vmem:[#allocation5 + $0x3a0] sm:$0xff]  ;;  %v157_v2 = vld [vmem:[#allocation5 + $0x398] sm:$0xff]  ;;  %v549_v13 = vrot.slane %v2370_v59, %v2390_v3 }
  0x40   :  { %1849 = vmatpush3.msra.mxu1 %v153_v14  ;;  %1815 = vmatprep.subr.mxu0 %v136_v15  ;;  %v110_v61 = vld [vmem:[#allocation5 + $0x220] sm:$0xff]  ;;  %v109_v4 = vld [vmem:[#allocation5 + $0x218] sm:$0xff]  ;;  %v124_v6 = vld [vmem:[#allocation5 + $0x290] sm:$0xff]  ;;  %v2398_v14 = vsub.s32 7, %v2365_v47 }
  0x41   :  { %1850 = vmatprep.subr.mxu1 %v168_v16  ;;  %1816 = vmatpush3.msra.mxu0 %v120_v17  ;;  %v142_v62 = vld [vmem:[#allocation5 + $0x320] sm:$0xff]  ;;  %v141_v5 = vld [vmem:[#allocation5 + $0x318] sm:$0xff]  ;;  %v156_v7 = vld [vmem:[#allocation5 + $0x390] sm:$0xff]  ;;  %v2401_v16 = vsub.s32 6, %v2365_v47 }
  0x42   :  { %1851 = vmatpush3.msra.mxu1 %v152_v18  ;;  %1817 = vmatprep.subr.mxu0 %v135_v19  ;;  %v108_v8 = vld [vmem:[#allocation5 + $0x210] sm:$0xff]  ;;  %v123_v11 = vld [vmem:[#allocation5 + $0x288] sm:$0xff]  ;;  %v122_v17 = vld [vmem:[#allocation5 + $0x280] sm:$0xff] }
  0x43   :  { %1852 = vmatprep.subr.mxu1 %v167_v20  ;;  %1818 = vmatpush3.msra.mxu0 %v119_v21  ;;  %v140_v9 = vld [vmem:[#allocation5 + $0x310] sm:$0xff]  ;;  %v155_v12 = vld [vmem:[#allocation5 + $0x388] sm:$0xff]  ;;  %v106_v19 = vld [vmem:[#allocation5 + $0x200] sm:$0xff]  ;;  %v545_v20 = vrot.slane %v2370_v59, %v2393_v10 }
  0x44   :  { %1853 = vmatpush3.msra.mxu1 %v151_v22  ;;  %1819 = vmatprep.subr.mxu0 %v134_v23  ;;  %v107_v15 = vld [vmem:[#allocation5 + $0x208] sm:$0xff]  ;;  %v154_v21 = vld [vmem:[#allocation5 + $0x380] sm:$0xff]  ;;  %v201_v22 = vld [vmem:[#allocation5 + $0x4f8] sm:$0xff]  ;;  %v557_v23 = vrot.slane %v2370_v59, %v2398_v14 }
  0x45   :  { %1854 = vmatprep.subr.mxu1 %v166_v24  ;;  %1820 = vmatpush3.msra.mxu0 %v118_v25  ;;  %v139_v18 = vld [vmem:[#allocation5 + $0x308] sm:$0xff]  ;;  %v138_v47 = vld [vmem:[#allocation5 + $0x300] sm:$0xff]  ;;  %v553_v24 = vrot.slane %v2370_v59, %v2401_v16  ;;  %v185_v25 = vld [vmem:[#allocation5 + $0x478] sm:$0xff] }
  0x46   :  { %1855 = vmatpush3.msra.mxu1 %v150_v26  ;;  %1821 = vmatprep.subr.mxu0 %v133_v27  ;;  %v200_v26 = vld [vmem:[#allocation5 + $0x4f0] sm:$0xff]  ;;  %v233_v27 = vld [vmem:[#allocation5 + $0x5f8] sm:$0xff]  ;;  %v198_v59 = vld [vmem:[#allocation5 + $0x4e0] sm:$0xff] }
  0x47   :  { %1856 = vmatprep.subr.mxu1 %v165_v28  ;;  %1822 = vmatpush3.msra.mxu0 %v117_v29  ;;  %v184_v28 = vld [vmem:[#allocation5 + $0x470] sm:$0xff]  ;;  %v217_v29 = vld [vmem:[#allocation5 + $0x578] sm:$0xff] }
  0x48   :  { %1857 = vmatpush3.msra.mxu1 %v149_v30  ;;  %1823 = vmatprep.subr.mxu0 %v132_v31  ;;  %v199_v30 = vld [vmem:[#allocation5 + $0x4e8] sm:$0xff]  ;;  %v232_v31 = vld [vmem:[#allocation5 + $0x5f0] sm:$0xff] }
  0x49   :  { %1858 = vmatprep.subr.mxu1 %v164_v32  ;;  %1824 = vmatpush3.msra.mxu0 %v116_v33  ;;  %v183_v32 = vld [vmem:[#allocation5 + $0x468] sm:$0xff]  ;;  %v216_v33 = vld [vmem:[#allocation5 + $0x570] sm:$0xff] }
  0x4a   :  { %1859 = vmatpush3.msra.mxu1 %v148_v34  ;;  %1825 = vmatprep.subr.mxu0 %v131_v35  ;;  %v231_v34 = vld [vmem:[#allocation5 + $0x5e8] sm:$0xff]  ;;  %v182_v35 = vld [vmem:[#allocation5 + $0x460] sm:$0xff] }
  0x4b   :  { %1860 = vmatprep.subr.mxu1 %v163_v36  ;;  %1826 = vmatpush3.msra.mxu0 %v115_v37  ;;  %v215_v36 = vld [vmem:[#allocation5 + $0x568] sm:$0xff]  ;;  %v197_v37 = vld [vmem:[#allocation5 + $0x4d8] sm:$0xff] }
  0x4c   :  { %1861 = vmatpush3.msra.mxu1 %v147_v38  ;;  %1827 = vmatprep.subr.mxu0 %v130_v39  ;;  %v230_v38 = vld [vmem:[#allocation5 + $0x5e0] sm:$0xff]  ;;  %v181_v39 = vld [vmem:[#allocation5 + $0x458] sm:$0xff] }
  0x4d   :  { %1862 = vmatprep.subr.mxu1 %v162_v40  ;;  %1828 = vmatpush3.msra.mxu0 %v114_v41  ;;  %v214_v40 = vld [vmem:[#allocation5 + $0x560] sm:$0xff]  ;;  %v196_v41 = vld [vmem:[#allocation5 + $0x4d0] sm:$0xff] }
  0x4e   :  { %1863 = vmatpush3.msra.mxu1 %v146_v42  ;;  %1829 = vmatprep.subr.mxu0 %v129_v43  ;;  %v229_v42 = vld [vmem:[#allocation5 + $0x5d8] sm:$0xff]  ;;  %v180_v43 = vld [vmem:[#allocation5 + $0x450] sm:$0xff] }
  0x4f   :  { %1864 = vmatprep.subr.mxu1 %v161_v44  ;;  %1830 = vmatpush3.msra.mxu0 %v113_v45  ;;  %v213_v44 = vld [vmem:[#allocation5 + $0x558] sm:$0xff]  ;;  %v195_v45 = vld [vmem:[#allocation5 + $0x4c8] sm:$0xff] }
  0x50   :  { %1865 = vmatpush3.msra.mxu1 %v145_v46  ;;  %1831 = vmatprep.subr.mxu0 %v128_v48  ;;  %v228_v46 = vld [vmem:[#allocation5 + $0x5d0] sm:$0xff]  ;;  %v179_v48 = vld [vmem:[#allocation5 + $0x448] sm:$0xff] }
  0x51   :  { %1866 = vmatprep.subr.mxu1 %v160_v49  ;;  %1832 = vmatpush3.msra.mxu0 %v112_v50  ;;  %v212_v49 = vld [vmem:[#allocation5 + $0x550] sm:$0xff]  ;;  %v194_v50 = vld [vmem:[#allocation5 + $0x4c0] sm:$0xff] }
  0x52   :  { %1867 = vmatpush3.msra.mxu1 %v144_v51  ;;  %1833 = vmatprep.subr.mxu0 %v127_v52  ;;  %v227_v51 = vld [vmem:[#allocation5 + $0x5c8] sm:$0xff]  ;;  %v178_v52 = vld [vmem:[#allocation5 + $0x440] sm:$0xff] }
  0x53   :  { %1868 = vmatprep.subr.mxu1 %v159_v53  ;;  %1834 = vmatpush3.msra.mxu0 %v111_v54  ;;  %v211_v53 = vld [vmem:[#allocation5 + $0x548] sm:$0xff]  ;;  %v193_v54 = vld [vmem:[#allocation5 + $0x4b8] sm:$0xff] }
  0x54   :  { %1869 = vmatpush3.msra.mxu1 %v143_v55  ;;  %1835 = vmatprep.subr.mxu0 %v126_v57  ;;  %v226_v55 = vld [vmem:[#allocation5 + $0x5c0] sm:$0xff]  ;;  %v177_v57 = vld [vmem:[#allocation5 + $0x438] sm:$0xff] }
  0x55   :  { %1870 = vmatprep.subr.mxu1 %v158_v58  ;;  %1836 = vmatpush3.msra.mxu0 %v110_v61  ;;  %v210_v58 = vld [vmem:[#allocation5 + $0x540] sm:$0xff]  ;;  %v192_v61 = vld [vmem:[#allocation5 + $0x4b0] sm:$0xff] }
  0x56   :  { %1871 = vmatpush3.msra.mxu1 %v142_v62  ;;  %1837 = vmatprep.subr.mxu0 %v125_v1  ;;  %v225_v62 = vld [vmem:[#allocation5 + $0x5b8] sm:$0xff]  ;;  %v176_v1 = vld [vmem:[#allocation5 + $0x430] sm:$0xff] }
  0x57   :  { %1872 = vmatprep.subr.mxu1 %v157_v2  ;;  %1838 = vmatpush3.msra.mxu0 %v109_v4  ;;  %v209_v2 = vld [vmem:[#allocation5 + $0x538] sm:$0xff]  ;;  %v191_v4 = vld [vmem:[#allocation5 + $0x4a8] sm:$0xff] }
  0x58   :  { %1873 = vmatpush3.msra.mxu1 %v141_v5  ;;  %1839 = vmatprep.subr.mxu0 %v124_v6  ;;  %v224_v5 = vld [vmem:[#allocation5 + $0x5b0] sm:$0xff]  ;;  %v175_v6 = vld [vmem:[#allocation5 + $0x428] sm:$0xff] }
  0x59   :  { %1874 = vmatprep.subr.mxu1 %v156_v7  ;;  %1840 = vmatpush3.msra.mxu0 %v108_v8  ;;  %v208_v7 = vld [vmem:[#allocation5 + $0x530] sm:$0xff]  ;;  %v190_v8 = vld [vmem:[#allocation5 + $0x4a0] sm:$0xff] }
  0x5a   :  { %1875 = vmatpush3.msra.mxu1 %v140_v9  ;;  %1841 = vmatprep.subr.mxu0 %v123_v11  ;;  %v223_v9 = vld [vmem:[#allocation5 + $0x5a8] sm:$0xff]  ;;  %v174_v11 = vld [vmem:[#allocation5 + $0x420] sm:$0xff] }
  0x5b   :  { %1876 = vmatprep.subr.mxu1 %v155_v12  ;;  %1842 = vmatpush3.msra.mxu0 %v107_v15  ;;  %v207_v12 = vld [vmem:[#allocation5 + $0x528] sm:$0xff]  ;;  %v222_v15 = vld [vmem:[#allocation5 + $0x5a0] sm:$0xff] }
  0x5c   :  { %880 = vmatprep.mubr.f32.mxu0 %v549_v13  ;;  %1843 = vmatprep.subr.mxu0 %v122_v17  ;;  %v189_v13 = vld [vmem:[#allocation5 + $0x498] sm:$0xff] }
  0x5d   :  { %1877 = vmatpush3.msra.mxu1 %v139_v18  ;;  %1844 = vmatpush3.msra.mxu0 %v106_v19  ;;  %v173_v17 = vld [vmem:[#allocation5 + $0x418] sm:$0xff]  ;;  %v206_v18 = vld [vmem:[#allocation5 + $0x520] sm:$0xff]  ;;  %v188_v19 = vld [vmem:[#allocation5 + $0x490] sm:$0xff] }
  0x5e   :  { %1878 = vmatprep.subr.mxu1 %v154_v21  ;;  %881 = vmatmul.mubr.f32.vlgmr.msra.gmra.mxu0 %v545_v20  ;;  %v221_v20 = vld [vmem:[#allocation5 + $0x598] sm:$0xff]  ;;  %v172_v21 = vld [vmem:[#allocation5 + $0x410] sm:$0xff] }
  0x5f   :  { %1883 = vmatprep.subr.mxu0 %v201_v22  ;;  %1879 = vmatpush3.msra.mxu1 %v138_v47  ;;  %v205_v22 = vld [vmem:[#allocation5 + $0x518] sm:$0xff]  ;;  %v187_v47 = vld [vmem:[#allocation5 + $0x488] sm:$0xff] }
  0x60   :  { %950 = vmatprep.mubr.f32.mxu1 %v557_v23  ;;  %1884 = vmatpush3.msra.mxu0 %v185_v25  ;;  %v2409_v23 = vld [vmem:[#allocation2 + $0x8] sm:$0xff] }
  0x61   :  { %951 = vmatmul.mubr.f32.vlgmr.msra.gmra.mxu1 %v553_v24  ;;  %1885 = vmatprep.subr.mxu0 %v200_v26  ;;  %v220_v24 = vld [vmem:[#allocation5 + $0x590] sm:$0xff]  ;;  %v171_v25 = vld [vmem:[#allocation5 + $0x408] sm:$0xff] }
  0x62   :  { %1918 = vmatprep.subr.mxu1 %v233_v27  ;;  %1886 = vmatpush3.msra.mxu0 %v184_v28  ;;  %v204_v26 = vld [vmem:[#allocation5 + $0x510] sm:$0xff]  ;;  %v186_v27 = vld [vmem:[#allocation5 + $0x480] sm:$0xff]  ;;  %v219_v28 = vld [vmem:[#allocation5 + $0x588] sm:$0xff] }
  0x63   :  { %1919 = vmatpush3.msra.mxu1 %v217_v29  ;;  %1887 = vmatprep.subr.mxu0 %v199_v30  ;;  %v565_v29 = vrot.slane %v2409_v23, %v2368_v56  ;;  %v170_v30 = vld [vmem:[#allocation5 + $0x400] sm:$0xff] }
  0x64   :  { %1920 = vmatprep.subr.mxu1 %v232_v31  ;;  %1888 = vmatpush3.msra.mxu0 %v183_v32  ;;  %v561_v31 = vrot.slane %v2409_v23, %v2376_v63  ;;  %v203_v32 = vld [vmem:[#allocation5 + $0x508] sm:$0xff] }
  0x65   :  { %1921 = vmatpush3.msra.mxu1 %v216_v33  ;;  %1889 = vmatprep.subr.mxu0 %v198_v59  ;;  %v218_v33 = vld [vmem:[#allocation5 + $0x580] sm:$0xff]  ;;  %v265_v59 = vld [vmem:[#allocation5 + $0x6f8] sm:$0xff] }
  0x66   :  { %1922 = vmatprep.subr.mxu1 %v231_v34  ;;  %1890 = vmatpush3.msra.mxu0 %v182_v35  ;;  %v573_v34 = vrot.slane %v2409_v23, %v2373_v60  ;;  %v202_v35 = vld [vmem:[#allocation5 + $0x500] sm:$0xff] }
  0x67   :  { %1923 = vmatpush3.msra.mxu1 %v215_v36  ;;  %1891 = vmatprep.subr.mxu0 %v197_v37  ;;  %v569_v36 = vrot.slane %v2409_v23, %v2379_v0  ;;  %v249_v37 = vld [vmem:[#allocation5 + $0x678] sm:$0xff] }
  0x68   :  { %1924 = vmatprep.subr.mxu1 %v230_v38  ;;  %1892 = vmatpush3.msra.mxu0 %v181_v39  ;;  %v264_v38 = vld [vmem:[#allocation5 + $0x6f0] sm:$0xff]  ;;  %v297_v39 = vld [vmem:[#allocation5 + $0x7f8] sm:$0xff] }
  0x69   :  { %1925 = vmatpush3.msra.mxu1 %v214_v40  ;;  %1893 = vmatprep.subr.mxu0 %v196_v41  ;;  %v248_v40 = vld [vmem:[#allocation5 + $0x670] sm:$0xff]  ;;  %v281_v41 = vld [vmem:[#allocation5 + $0x778] sm:$0xff] }
  0x6a   :  { %1926 = vmatprep.subr.mxu1 %v229_v42  ;;  %1894 = vmatpush3.msra.mxu0 %v180_v43  ;;  %v263_v42 = vld [vmem:[#allocation5 + $0x6e8] sm:$0xff]  ;;  %v296_v43 = vld [vmem:[#allocation5 + $0x7f0] sm:$0xff] }
  0x6b   :  { %1927 = vmatpush3.msra.mxu1 %v213_v44  ;;  %1895 = vmatprep.subr.mxu0 %v195_v45  ;;  %v247_v44 = vld [vmem:[#allocation5 + $0x668] sm:$0xff]  ;;  %v280_v45 = vld [vmem:[#allocation5 + $0x770] sm:$0xff] }
  0x6c   :  { %1928 = vmatprep.subr.mxu1 %v228_v46  ;;  %1896 = vmatpush3.msra.mxu0 %v179_v48  ;;  %v262_v46 = vld [vmem:[#allocation5 + $0x6e0] sm:$0xff]  ;;  %v295_v48 = vld [vmem:[#allocation5 + $0x7e8] sm:$0xff] }
  0x6d   :  { %1929 = vmatpush3.msra.mxu1 %v212_v49  ;;  %1897 = vmatprep.subr.mxu0 %v194_v50  ;;  %v246_v49 = vld [vmem:[#allocation5 + $0x660] sm:$0xff]  ;;  %v279_v50 = vld [vmem:[#allocation5 + $0x768] sm:$0xff] }
  0x6e   :  { %1930 = vmatprep.subr.mxu1 %v227_v51  ;;  %1898 = vmatpush3.msra.mxu0 %v178_v52  ;;  %v261_v51 = vld [vmem:[#allocation5 + $0x6d8] sm:$0xff]  ;;  %v294_v52 = vld [vmem:[#allocation5 + $0x7e0] sm:$0xff] }
  0x6f   :  { %1931 = vmatpush3.msra.mxu1 %v211_v53  ;;  %1899 = vmatprep.subr.mxu0 %v193_v54  ;;  %v245_v53 = vld [vmem:[#allocation5 + $0x658] sm:$0xff]  ;;  %v278_v54 = vld [vmem:[#allocation5 + $0x760] sm:$0xff] }
  0x70   :  { %1932 = vmatprep.subr.mxu1 %v226_v55  ;;  %1900 = vmatpush3.msra.mxu0 %v177_v57  ;;  %v260_v55 = vld [vmem:[#allocation5 + $0x6d0] sm:$0xff]  ;;  %v293_v57 = vld [vmem:[#allocation5 + $0x7d8] sm:$0xff] }
  0x71   :  { %1933 = vmatpush3.msra.mxu1 %v210_v58  ;;  %1901 = vmatprep.subr.mxu0 %v192_v61  ;;  %v244_v58 = vld [vmem:[#allocation5 + $0x650] sm:$0xff]  ;;  %v277_v61 = vld [vmem:[#allocation5 + $0x758] sm:$0xff] }
  0x72   :  { %1934 = vmatprep.subr.mxu1 %v225_v62  ;;  %1902 = vmatpush3.msra.mxu0 %v176_v1  ;;  %v259_v62 = vld [vmem:[#allocation5 + $0x6c8] sm:$0xff]  ;;  %v292_v1 = vld [vmem:[#allocation5 + $0x7d0] sm:$0xff] }
  0x73   :  { %1935 = vmatpush3.msra.mxu1 %v209_v2  ;;  %1903 = vmatprep.subr.mxu0 %v191_v4  ;;  %v243_v2 = vld [vmem:[#allocation5 + $0x648] sm:$0xff]  ;;  %v276_v4 = vld [vmem:[#allocation5 + $0x750] sm:$0xff] }
  0x74   :  { %1936 = vmatprep.subr.mxu1 %v224_v5  ;;  %1904 = vmatpush3.msra.mxu0 %v175_v6  ;;  %v258_v5 = vld [vmem:[#allocation5 + $0x6c0] sm:$0xff]  ;;  %v291_v6 = vld [vmem:[#allocation5 + $0x7c8] sm:$0xff] }
  0x75   :  { %1937 = vmatpush3.msra.mxu1 %v208_v7  ;;  %1905 = vmatprep.subr.mxu0 %v190_v8  ;;  %v242_v7 = vld [vmem:[#allocation5 + $0x640] sm:$0xff]  ;;  %v275_v8 = vld [vmem:[#allocation5 + $0x748] sm:$0xff] }
  0x76   :  { %1938 = vmatprep.subr.mxu1 %v223_v9  ;;  %1906 = vmatpush3.msra.mxu0 %v174_v11  ;;  %v257_v9 = vld [vmem:[#allocation5 + $0x6b8] sm:$0xff]  ;;  %v290_v11 = vld [vmem:[#allocation5 + $0x7c0] sm:$0xff] }
  0x77   :  { %1939 = vmatpush3.msra.mxu1 %v207_v12  ;;  %1907 = vmatprep.subr.mxu0 %v189_v13  ;;  %v241_v12 = vld [vmem:[#allocation5 + $0x638] sm:$0xff]  ;;  %v274_v13 = vld [vmem:[#allocation5 + $0x740] sm:$0xff] }
  0x78   :  { %1940 = vmatprep.subr.mxu1 %v222_v15  ;;  %1908 = vmatpush3.msra.mxu0 %v173_v17  ;;  %v256_v15 = vld [vmem:[#allocation5 + $0x6b0] sm:$0xff]  ;;  %v289_v17 = vld [vmem:[#allocation5 + $0x7b8] sm:$0xff] }
  0x79   :  { %1941 = vmatpush3.msra.mxu1 %v206_v18  ;;  %1909 = vmatprep.subr.mxu0 %v188_v19  ;;  %v240_v18 = vld [vmem:[#allocation5 + $0x630] sm:$0xff]  ;;  %v273_v19 = vld [vmem:[#allocation5 + $0x738] sm:$0xff] }
  0x7a   :  { %1942 = vmatprep.subr.mxu1 %v221_v20  ;;  %1910 = vmatpush3.msra.mxu0 %v172_v21  ;;  %v255_v20 = vld [vmem:[#allocation5 + $0x6a8] sm:$0xff]  ;;  %v288_v21 = vld [vmem:[#allocation5 + $0x7b0] sm:$0xff] }
  0x7b   :  { %1943 = vmatpush3.msra.mxu1 %v205_v22  ;;  %1911 = vmatprep.subr.mxu0 %v187_v47  ;;  %v239_v22 = vld [vmem:[#allocation5 + $0x628] sm:$0xff]  ;;  %v272_v47 = vld [vmem:[#allocation5 + $0x730] sm:$0xff] }
  0x7c   :  { %1944 = vmatprep.subr.mxu1 %v220_v24  ;;  %1912 = vmatpush3.msra.mxu0 %v171_v25  ;;  %v254_v24 = vld [vmem:[#allocation5 + $0x6a0] sm:$0xff]  ;;  %v287_v25 = vld [vmem:[#allocation5 + $0x7a8] sm:$0xff] }
  0x7d   :  { %1945 = vmatpush3.msra.mxu1 %v204_v26  ;;  %1913 = vmatprep.subr.mxu0 %v186_v27  ;;  %v238_v26 = vld [vmem:[#allocation5 + $0x620] sm:$0xff]  ;;  %v271_v27 = vld [vmem:[#allocation5 + $0x728] sm:$0xff] }
  0x7e   :  { %1946 = vmatprep.subr.mxu1 %v219_v28  ;;  %1914 = vmatpush3.msra.mxu0 %v170_v30  ;;  %v253_v28 = vld [vmem:[#allocation5 + $0x698] sm:$0xff] }
  0x7f   :  { %1020 = vmatprep.mubr.f32.mxu0 %v565_v29  ;;  %1947 = vmatpush3.msra.mxu1 %v203_v32  ;;  %v286_v29 = vld [vmem:[#allocation5 + $0x7a0] sm:$0xff]  ;;  %v237_v30 = vld [vmem:[#allocation5 + $0x618] sm:$0xff]  ;;  %v252_v32 = vld [vmem:[#allocation5 + $0x690] sm:$0xff] }
  0x80   :  { %1021 = vmatmul.mubr.f32.vlgmr.msra.gmra.mxu0 %v561_v31  ;;  %1948 = vmatprep.subr.mxu1 %v218_v33  ;;  %v270_v31 = vld [vmem:[#allocation5 + $0x720] sm:$0xff]  ;;  %v285_v33 = vld [vmem:[#allocation5 + $0x798] sm:$0xff] }
  0x81   :  { %1953 = vmatprep.subr.mxu0 %v265_v59  ;;  %1949 = vmatpush3.msra.mxu1 %v202_v35  ;;  %v236_v59 = vld [vmem:[#allocation5 + $0x610] sm:$0xff]  ;;  %v251_v35 = vld [vmem:[#allocation5 + $0x688] sm:$0xff] }
  0x82   :  { %1090 = vmatprep.mubr.f32.mxu1 %v573_v34  ;;  %1954 = vmatpush3.msra.mxu0 %v249_v37  ;;  %v269_v34 = vld [vmem:[#allocation5 + $0x718] sm:$0xff]  ;;  %v235_v37 = vld [vmem:[#allocation5 + $0x608] sm:$0xff] }
  0x83   :  { %1091 = vmatmul.mubr.f32.vlgmr.msra.gmra.mxu1 %v569_v36  ;;  %1955 = vmatprep.subr.mxu0 %v264_v38  ;;  %v284_v36 = vld [vmem:[#allocation5 + $0x790] sm:$0xff] }
  0x84   :  { %1988 = vmatprep.subr.mxu1 %v297_v39  ;;  %1956 = vmatpush3.msra.mxu0 %v248_v40  ;;  %v268_v38 = vld [vmem:[#allocation5 + $0x710] sm:$0xff]  ;;  %v250_v39 = vld [vmem:[#allocation5 + $0x680] sm:$0xff]  ;;  %v283_v40 = vld [vmem:[#allocation5 + $0x788] sm:$0xff] }
  0x85   :  { %1989 = vmatpush3.msra.mxu1 %v281_v41  ;;  %1957 = vmatprep.subr.mxu0 %v263_v42  ;;  %v581_v41 = vrot.slane %v2409_v23, %v2390_v3  ;;  %v234_v42 = vld [vmem:[#allocation5 + $0x600] sm:$0xff] }
  0x86   :  { %1990 = vmatprep.subr.mxu1 %v296_v43  ;;  %1958 = vmatpush3.msra.mxu0 %v247_v44  ;;  %v577_v43 = vrot.slane %v2409_v23, %v2393_v10  ;;  %v267_v44 = vld [vmem:[#allocation5 + $0x708] sm:$0xff] }
  0x87   :  { %1991 = vmatpush3.msra.mxu1 %v280_v45  ;;  %1959 = vmatprep.subr.mxu0 %v262_v46  ;;  %v282_v45 = vld [vmem:[#allocation5 + $0x780] sm:$0xff]  ;;  %v329_v46 = vld [vmem:[#allocation5 + $0x8f8] sm:$0xff] }
  0x88   :  { %1992 = vmatprep.subr.mxu1 %v295_v48  ;;  %1960 = vmatpush3.msra.mxu0 %v246_v49  ;;  %v589_v48 = vrot.slane %v2409_v23, %v2398_v14  ;;  %v266_v49 = vld [vmem:[#allocation5 + $0x700] sm:$0xff] }
  0x89   :  { %1993 = vmatpush3.msra.mxu1 %v279_v50  ;;  %1961 = vmatprep.subr.mxu0 %v261_v51  ;;  %v585_v50 = vrot.slane %v2409_v23, %v2401_v16  ;;  %v313_v51 = vld [vmem:[#allocation5 + $0x878] sm:$0xff]  ;;  %v326_v23 = vld [vmem:[#allocation5 + $0x8e0] sm:$0xff] }
  0x8a   :  { %1994 = vmatprep.subr.mxu1 %v294_v52  ;;  %1962 = vmatpush3.msra.mxu0 %v245_v53  ;;  %v328_v52 = vld [vmem:[#allocation5 + $0x8f0] sm:$0xff]  ;;  %v361_v53 = vld [vmem:[#allocation5 + $0x9f8] sm:$0xff] }
  0x8b   :  { %1995 = vmatpush3.msra.mxu1 %v278_v54  ;;  %1963 = vmatprep.subr.mxu0 %v260_v55  ;;  %v312_v54 = vld [vmem:[#allocation5 + $0x870] sm:$0xff]  ;;  %v345_v55 = vld [vmem:[#allocation5 + $0x978] sm:$0xff] }
  0x8c   :  { %1996 = vmatprep.subr.mxu1 %v293_v57  ;;  %1964 = vmatpush3.msra.mxu0 %v244_v58  ;;  %v327_v57 = vld [vmem:[#allocation5 + $0x8e8] sm:$0xff]  ;;  %v360_v58 = vld [vmem:[#allocation5 + $0x9f0] sm:$0xff] }
  0x8d   :  { %1997 = vmatpush3.msra.mxu1 %v277_v61  ;;  %1965 = vmatprep.subr.mxu0 %v259_v62  ;;  %v311_v61 = vld [vmem:[#allocation5 + $0x868] sm:$0xff]  ;;  %v344_v62 = vld [vmem:[#allocation5 + $0x970] sm:$0xff] }
  0x8e   :  { %1998 = vmatprep.subr.mxu1 %v292_v1  ;;  %1966 = vmatpush3.msra.mxu0 %v243_v2  ;;  %v359_v1 = vld [vmem:[#allocation5 + $0x9e8] sm:$0xff]  ;;  %v310_v2 = vld [vmem:[#allocation5 + $0x860] sm:$0xff] }
  0x8f   :  { %1999 = vmatpush3.msra.mxu1 %v276_v4  ;;  %1967 = vmatprep.subr.mxu0 %v258_v5  ;;  %v343_v4 = vld [vmem:[#allocation5 + $0x968] sm:$0xff]  ;;  %v325_v5 = vld [vmem:[#allocation5 + $0x8d8] sm:$0xff] }
  0x90   :  { %2000 = vmatprep.subr.mxu1 %v291_v6  ;;  %1968 = vmatpush3.msra.mxu0 %v242_v7  ;;  %v358_v6 = vld [vmem:[#allocation5 + $0x9e0] sm:$0xff]  ;;  %v309_v7 = vld [vmem:[#allocation5 + $0x858] sm:$0xff] }
  0x91   :  { %2001 = vmatpush3.msra.mxu1 %v275_v8  ;;  %1969 = vmatprep.subr.mxu0 %v257_v9  ;;  %v342_v8 = vld [vmem:[#allocation5 + $0x960] sm:$0xff]  ;;  %v324_v9 = vld [vmem:[#allocation5 + $0x8d0] sm:$0xff] }
  0x92   :  { %2002 = vmatprep.subr.mxu1 %v290_v11  ;;  %1970 = vmatpush3.msra.mxu0 %v241_v12  ;;  %v357_v11 = vld [vmem:[#allocation5 + $0x9d8] sm:$0xff]  ;;  %v308_v12 = vld [vmem:[#allocation5 + $0x850] sm:$0xff] }
  0x93   :  { %2003 = vmatpush3.msra.mxu1 %v274_v13  ;;  %1971 = vmatprep.subr.mxu0 %v256_v15  ;;  %v341_v13 = vld [vmem:[#allocation5 + $0x958] sm:$0xff]  ;;  %v323_v15 = vld [vmem:[#allocation5 + $0x8c8] sm:$0xff] }
  0x94   :  { %2004 = vmatprep.subr.mxu1 %v289_v17  ;;  %1972 = vmatpush3.msra.mxu0 %v240_v18  ;;  %v356_v17 = vld [vmem:[#allocation5 + $0x9d0] sm:$0xff]  ;;  %v307_v18 = vld [vmem:[#allocation5 + $0x848] sm:$0xff] }
  0x95   :  { %2005 = vmatpush3.msra.mxu1 %v273_v19  ;;  %1973 = vmatprep.subr.mxu0 %v255_v20  ;;  %v340_v19 = vld [vmem:[#allocation5 + $0x950] sm:$0xff]  ;;  %v322_v20 = vld [vmem:[#allocation5 + $0x8c0] sm:$0xff] }
  0x96   :  { %2006 = vmatprep.subr.mxu1 %v288_v21  ;;  %1974 = vmatpush3.msra.mxu0 %v239_v22  ;;  %v355_v21 = vld [vmem:[#allocation5 + $0x9c8] sm:$0xff]  ;;  %v306_v22 = vld [vmem:[#allocation5 + $0x840] sm:$0xff] }
  0x97   :  { %2007 = vmatpush3.msra.mxu1 %v272_v47  ;;  %1975 = vmatprep.subr.mxu0 %v254_v24  ;;  %v339_v47 = vld [vmem:[#allocation5 + $0x948] sm:$0xff]  ;;  %v321_v24 = vld [vmem:[#allocation5 + $0x8b8] sm:$0xff] }
  0x98   :  { %2008 = vmatprep.subr.mxu1 %v287_v25  ;;  %1976 = vmatpush3.msra.mxu0 %v238_v26  ;;  %v354_v25 = vld [vmem:[#allocation5 + $0x9c0] sm:$0xff]  ;;  %v305_v26 = vld [vmem:[#allocation5 + $0x838] sm:$0xff] }
  0x99   :  { %2009 = vmatpush3.msra.mxu1 %v271_v27  ;;  %1977 = vmatprep.subr.mxu0 %v253_v28  ;;  %v338_v27 = vld [vmem:[#allocation5 + $0x940] sm:$0xff]  ;;  %v320_v28 = vld [vmem:[#allocation5 + $0x8b0] sm:$0xff] }
  0x9a   :  { %2010 = vmatprep.subr.mxu1 %v286_v29  ;;  %1978 = vmatpush3.msra.mxu0 %v237_v30  ;;  %v353_v29 = vld [vmem:[#allocation5 + $0x9b8] sm:$0xff]  ;;  %v304_v30 = vld [vmem:[#allocation5 + $0x830] sm:$0xff] }
  0x9b   :  { %2011 = vmatpush3.msra.mxu1 %v270_v31  ;;  %1979 = vmatprep.subr.mxu0 %v252_v32  ;;  %v337_v31 = vld [vmem:[#allocation5 + $0x938] sm:$0xff]  ;;  %v319_v32 = vld [vmem:[#allocation5 + $0x8a8] sm:$0xff] }
  0x9c   :  { %2012 = vmatprep.subr.mxu1 %v285_v33  ;;  %1980 = vmatpush3.msra.mxu0 %v236_v59  ;;  %v352_v33 = vld [vmem:[#allocation5 + $0x9b0] sm:$0xff]  ;;  %v303_v59 = vld [vmem:[#allocation5 + $0x828] sm:$0xff] }
  0x9d   :  { %2013 = vmatpush3.msra.mxu1 %v269_v34  ;;  %1981 = vmatprep.subr.mxu0 %v251_v35  ;;  %v336_v34 = vld [vmem:[#allocation5 + $0x930] sm:$0xff]  ;;  %v318_v35 = vld [vmem:[#allocation5 + $0x8a0] sm:$0xff] }
  0x9e   :  { %2014 = vmatprep.subr.mxu1 %v284_v36  ;;  %1982 = vmatpush3.msra.mxu0 %v235_v37  ;;  %v351_v36 = vld [vmem:[#allocation5 + $0x9a8] sm:$0xff]  ;;  %v302_v37 = vld [vmem:[#allocation5 + $0x820] sm:$0xff] }
  0x9f   :  { %2015 = vmatpush3.msra.mxu1 %v268_v38  ;;  %1983 = vmatprep.subr.mxu0 %v250_v39  ;;  %v335_v38 = vld [vmem:[#allocation5 + $0x928] sm:$0xff]  ;;  %v317_v39 = vld [vmem:[#allocation5 + $0x898] sm:$0xff] }
  0xa0   :  { %2016 = vmatprep.subr.mxu1 %v283_v40  ;;  %1984 = vmatpush3.msra.mxu0 %v234_v42  ;;  %v350_v40 = vld [vmem:[#allocation5 + $0x9a0] sm:$0xff] }
  0xa1   :  { %1160 = vmatprep.mubr.f32.mxu0 %v581_v41  ;;  %2017 = vmatpush3.msra.mxu1 %v267_v44  ;;  %v301_v41 = vld [vmem:[#allocation5 + $0x818] sm:$0xff]  ;;  %v334_v42 = vld [vmem:[#allocation5 + $0x920] sm:$0xff] }
  0xa2   :  { %1161 = vmatmul.mubr.f32.vlgmr.msra.gmra.mxu0 %v577_v43  ;;  %2018 = vmatprep.subr.mxu1 %v282_v45  ;;  %v316_v43 = vld [vmem:[#allocation5 + $0x890] sm:$0xff]  ;;  %v349_v44 = vld [vmem:[#allocation5 + $0x998] sm:$0xff] }
  0xa3   :  { %2023 = vmatprep.subr.mxu0 %v329_v46  ;;  %2019 = vmatpush3.msra.mxu1 %v266_v49  ;;  %v300_v45 = vld [vmem:[#allocation5 + $0x810] sm:$0xff]  ;;  %v333_v46 = vld [vmem:[#allocation5 + $0x918] sm:$0xff]  ;;  %v315_v49 = vld [vmem:[#allocation5 + $0x888] sm:$0xff] }
  0xa4   :  { %1230 = vmatprep.mubr.f32.mxu1 %v589_v48  ;;  %2024 = vmatpush3.msra.mxu0 %v313_v51  ;;  %v2427_v48 = vld [vmem:[#allocation2 + $0x10] sm:$0xff]  ;;  %v299_v51 = vld [vmem:[#allocation5 + $0x808] sm:$0xff] }
  0xa5   :  { %1231 = vmatmul.mubr.f32.vlgmr.msra.gmra.mxu1 %v585_v50  ;;  %2025 = vmatprep.subr.mxu0 %v328_v52  ;;  %v348_v50 = vld [vmem:[#allocation5 + $0x990] sm:$0xff] }
  0xa6   :  { %2058 = vmatprep.subr.mxu1 %v361_v53  ;;  %2026 = vmatpush3.msra.mxu0 %v312_v54  ;;  %v332_v52 = vld [vmem:[#allocation5 + $0x910] sm:$0xff]  ;;  %v314_v53 = vld [vmem:[#allocation5 + $0x880] sm:$0xff]  ;;  %v347_v54 = vld [vmem:[#allocation5 + $0x988] sm:$0xff] }
  0xa7   :  { %2059 = vmatpush3.msra.mxu1 %v345_v55  ;;  %2027 = vmatprep.subr.mxu0 %v327_v57  ;;  %v597_v55 = vrot.slane %v2427_v48, %v2368_v56  ;;  %v298_v57 = vld [vmem:[#allocation5 + $0x800] sm:$0xff] }
  0xa8   :  { %2060 = vmatprep.subr.mxu1 %v360_v58  ;;  %2028 = vmatpush3.msra.mxu0 %v311_v61  ;;  %v593_v58 = vrot.slane %v2427_v48, %v2376_v63  ;;  %v331_v61 = vld [vmem:[#allocation5 + $0x908] sm:$0xff] }
  0xa9   :  { %2061 = vmatpush3.msra.mxu1 %v344_v62  ;;  %2029 = vmatprep.subr.mxu0 %v326_v23  ;;  %v346_v62 = vld [vmem:[#allocation5 + $0x980] sm:$0xff]  ;;  %v393_v23 = vld [vmem:[#allocation5 + $0xaf8] sm:$0xff] }
  0xaa   :  { %2062 = vmatprep.subr.mxu1 %v359_v1  ;;  %2030 = vmatpush3.msra.mxu0 %v310_v2  ;;  %v605_v1 = vrot.slane %v2427_v48, %v2373_v60  ;;  %v330_v2 = vld [vmem:[#allocation5 + $0x900] sm:$0xff] }
  0xab   :  { %2063 = vmatpush3.msra.mxu1 %v343_v4  ;;  %2031 = vmatprep.subr.mxu0 %v325_v5  ;;  %v601_v4 = vrot.slane %v2427_v48, %v2379_v0  ;;  %v377_v5 = vld [vmem:[#allocation5 + $0xa78] sm:$0xff] }
  0xac   :  { %2064 = vmatprep.subr.mxu1 %v358_v6  ;;  %2032 = vmatpush3.msra.mxu0 %v309_v7  ;;  %v392_v6 = vld [vmem:[#allocation5 + $0xaf0] sm:$0xff]  ;;  %v425_v7 = vld [vmem:[#allocation5 + $0xbf8] sm:$0xff] }
  0xad   :  { %2065 = vmatpush3.msra.mxu1 %v342_v8  ;;  %2033 = vmatprep.subr.mxu0 %v324_v9  ;;  %v376_v8 = vld [vmem:[#allocation5 + $0xa70] sm:$0xff]  ;;  %v409_v9 = vld [vmem:[#allocation5 + $0xb78] sm:$0xff] }
  0xae   :  { %2066 = vmatprep.subr.mxu1 %v357_v11  ;;  %2034 = vmatpush3.msra.mxu0 %v308_v12  ;;  %v391_v11 = vld [vmem:[#allocation5 + $0xae8] sm:$0xff]  ;;  %v424_v12 = vld [vmem:[#allocation5 + $0xbf0] sm:$0xff] }
  0xaf   :  { %2067 = vmatpush3.msra.mxu1 %v341_v13  ;;  %2035 = vmatprep.subr.mxu0 %v323_v15  ;;  %v375_v13 = vld [vmem:[#allocation5 + $0xa68] sm:$0xff]  ;;  %v408_v15 = vld [vmem:[#allocation5 + $0xb70] sm:$0xff] }
  0xb0   :  { %2068 = vmatprep.subr.mxu1 %v356_v17  ;;  %2036 = vmatpush3.msra.mxu0 %v307_v18  ;;  %v390_v17 = vld [vmem:[#allocation5 + $0xae0] sm:$0xff]  ;;  %v423_v18 = vld [vmem:[#allocation5 + $0xbe8] sm:$0xff] }
  0xb1   :  { %2069 = vmatpush3.msra.mxu1 %v340_v19  ;;  %2037 = vmatprep.subr.mxu0 %v322_v20  ;;  %v374_v19 = vld [vmem:[#allocation5 + $0xa60] sm:$0xff]  ;;  %v407_v20 = vld [vmem:[#allocation5 + $0xb68] sm:$0xff] }
  0xb2   :  { %2070 = vmatprep.subr.mxu1 %v355_v21  ;;  %2038 = vmatpush3.msra.mxu0 %v306_v22  ;;  %v389_v21 = vld [vmem:[#allocation5 + $0xad8] sm:$0xff]  ;;  %v422_v22 = vld [vmem:[#allocation5 + $0xbe0] sm:$0xff] }
  0xb3   :  { %2071 = vmatpush3.msra.mxu1 %v339_v47  ;;  %2039 = vmatprep.subr.mxu0 %v321_v24  ;;  %v373_v47 = vld [vmem:[#allocation5 + $0xa58] sm:$0xff]  ;;  %v406_v24 = vld [vmem:[#allocation5 + $0xb60] sm:$0xff] }
  0xb4   :  { %2072 = vmatprep.subr.mxu1 %v354_v25  ;;  %2040 = vmatpush3.msra.mxu0 %v305_v26  ;;  %v388_v25 = vld [vmem:[#allocation5 + $0xad0] sm:$0xff]  ;;  %v421_v26 = vld [vmem:[#allocation5 + $0xbd8] sm:$0xff] }
  0xb5   :  { %2073 = vmatpush3.msra.mxu1 %v338_v27  ;;  %2041 = vmatprep.subr.mxu0 %v320_v28  ;;  %v372_v27 = vld [vmem:[#allocation5 + $0xa50] sm:$0xff]  ;;  %v405_v28 = vld [vmem:[#allocation5 + $0xb58] sm:$0xff] }
  0xb6   :  { %2074 = vmatprep.subr.mxu1 %v353_v29  ;;  %2042 = vmatpush3.msra.mxu0 %v304_v30  ;;  %v387_v29 = vld [vmem:[#allocation5 + $0xac8] sm:$0xff]  ;;  %v420_v30 = vld [vmem:[#allocation5 + $0xbd0] sm:$0xff] }
  0xb7   :  { %2075 = vmatpush3.msra.mxu1 %v337_v31  ;;  %2043 = vmatprep.subr.mxu0 %v319_v32  ;;  %v371_v31 = vld [vmem:[#allocation5 + $0xa48] sm:$0xff]  ;;  %v404_v32 = vld [vmem:[#allocation5 + $0xb50] sm:$0xff] }
  0xb8   :  { %2076 = vmatprep.subr.mxu1 %v352_v33  ;;  %2044 = vmatpush3.msra.mxu0 %v303_v59  ;;  %v386_v33 = vld [vmem:[#allocation5 + $0xac0] sm:$0xff]  ;;  %v419_v59 = vld [vmem:[#allocation5 + $0xbc8] sm:$0xff] }
  0xb9   :  { %2077 = vmatpush3.msra.mxu1 %v336_v34  ;;  %2045 = vmatprep.subr.mxu0 %v318_v35  ;;  %v370_v34 = vld [vmem:[#allocation5 + $0xa40] sm:$0xff]  ;;  %v403_v35 = vld [vmem:[#allocation5 + $0xb48] sm:$0xff] }
  0xba   :  { %2078 = vmatprep.subr.mxu1 %v351_v36  ;;  %2046 = vmatpush3.msra.mxu0 %v302_v37  ;;  %v385_v36 = vld [vmem:[#allocation5 + $0xab8] sm:$0xff]  ;;  %v418_v37 = vld [vmem:[#allocation5 + $0xbc0] sm:$0xff] }
  0xbb   :  { %2079 = vmatpush3.msra.mxu1 %v335_v38  ;;  %2047 = vmatprep.subr.mxu0 %v317_v39  ;;  %v369_v38 = vld [vmem:[#allocation5 + $0xa38] sm:$0xff]  ;;  %v402_v39 = vld [vmem:[#allocation5 + $0xb40] sm:$0xff] }
  0xbc   :  { %2080 = vmatprep.subr.mxu1 %v350_v40  ;;  %2048 = vmatpush3.msra.mxu0 %v301_v41  ;;  %v384_v40 = vld [vmem:[#allocation5 + $0xab0] sm:$0xff]  ;;  %v417_v41 = vld [vmem:[#allocation5 + $0xbb8] sm:$0xff] }
  0xbd   :  { %2081 = vmatpush3.msra.mxu1 %v334_v42  ;;  %2049 = vmatprep.subr.mxu0 %v316_v43  ;;  %v368_v42 = vld [vmem:[#allocation5 + $0xa30] sm:$0xff]  ;;  %v401_v43 = vld [vmem:[#allocation5 + $0xb38] sm:$0xff] }
  0xbe   :  { %2082 = vmatprep.subr.mxu1 %v349_v44  ;;  %2050 = vmatpush3.msra.mxu0 %v300_v45  ;;  %v383_v44 = vld [vmem:[#allocation5 + $0xaa8] sm:$0xff]  ;;  %v416_v45 = vld [vmem:[#allocation5 + $0xbb0] sm:$0xff] }
  0xbf   :  { %2083 = vmatpush3.msra.mxu1 %v333_v46  ;;  %2051 = vmatprep.subr.mxu0 %v315_v49  ;;  %v367_v46 = vld [vmem:[#allocation5 + $0xa28] sm:$0xff]  ;;  %v400_v49 = vld [vmem:[#allocation5 + $0xb30] sm:$0xff] }
  0xc0   :  { %2084 = vmatprep.subr.mxu1 %v348_v50  ;;  %2052 = vmatpush3.msra.mxu0 %v299_v51  ;;  %v382_v50 = vld [vmem:[#allocation5 + $0xaa0] sm:$0xff]  ;;  %v415_v51 = vld [vmem:[#allocation5 + $0xba8] sm:$0xff] }
  0xc1   :  { %2085 = vmatpush3.msra.mxu1 %v332_v52  ;;  %2053 = vmatprep.subr.mxu0 %v314_v53  ;;  %v366_v52 = vld [vmem:[#allocation5 + $0xa20] sm:$0xff]  ;;  %v399_v53 = vld [vmem:[#allocation5 + $0xb28] sm:$0xff] }
  0xc2   :  { %2086 = vmatprep.subr.mxu1 %v347_v54  ;;  %2054 = vmatpush3.msra.mxu0 %v298_v57  ;;  %v381_v54 = vld [vmem:[#allocation5 + $0xa98] sm:$0xff] }
  0xc3   :  { %1300 = vmatprep.mubr.f32.mxu0 %v597_v55  ;;  %2087 = vmatpush3.msra.mxu1 %v331_v61  ;;  %v414_v55 = vld [vmem:[#allocation5 + $0xba0] sm:$0xff]  ;;  %v365_v57 = vld [vmem:[#allocation5 + $0xa18] sm:$0xff]  ;;  %v380_v61 = vld [vmem:[#allocation5 + $0xa90] sm:$0xff] }
  0xc4   :  { %1301 = vmatmul.mubr.f32.vlgmr.msra.gmra.mxu0 %v593_v58  ;;  %2088 = vmatprep.subr.mxu1 %v346_v62  ;;  %v398_v58 = vld [vmem:[#allocation5 + $0xb20] sm:$0xff]  ;;  %v413_v62 = vld [vmem:[#allocation5 + $0xb98] sm:$0xff] }
  0xc5   :  { %2093 = vmatprep.subr.mxu0 %v393_v23  ;;  %2089 = vmatpush3.msra.mxu1 %v330_v2  ;;  %v364_v23 = vld [vmem:[#allocation5 + $0xa10] sm:$0xff]  ;;  %v379_v2 = vld [vmem:[#allocation5 + $0xa88] sm:$0xff] }
  0xc6   :  { %1370 = vmatprep.mubr.f32.mxu1 %v605_v1  ;;  %2094 = vmatpush3.msra.mxu0 %v377_v5  ;;  %v397_v1 = vld [vmem:[#allocation5 + $0xb18] sm:$0xff]  ;;  %v363_v5 = vld [vmem:[#allocation5 + $0xa08] sm:$0xff] }
  0xc7   :  { %1371 = vmatmul.mubr.f32.vlgmr.msra.gmra.mxu1 %v601_v4  ;;  %2095 = vmatprep.subr.mxu0 %v392_v6  ;;  %v412_v4 = vld [vmem:[#allocation5 + $0xb90] sm:$0xff] }
  0xc8   :  { %2128 = vmatprep.subr.mxu1 %v425_v7  ;;  %2096 = vmatpush3.msra.mxu0 %v376_v8  ;;  %v396_v6 = vld [vmem:[#allocation5 + $0xb10] sm:$0xff]  ;;  %v378_v7 = vld [vmem:[#allocation5 + $0xa80] sm:$0xff]  ;;  %v411_v8 = vld [vmem:[#allocation5 + $0xb88] sm:$0xff] }
  0xc9   :  { %2129 = vmatpush3.msra.mxu1 %v409_v9  ;;  %2097 = vmatprep.subr.mxu0 %v391_v11  ;;  %v613_v9 = vrot.slane %v2427_v48, %v2390_v3  ;;  %v362_v11 = vld [vmem:[#allocation5 + $0xa00] sm:$0xff] }
  0xca   :  { %2130 = vmatprep.subr.mxu1 %v424_v12  ;;  %2098 = vmatpush3.msra.mxu0 %v375_v13  ;;  %v609_v12 = vrot.slane %v2427_v48, %v2393_v10  ;;  %v395_v13 = vld [vmem:[#allocation5 + $0xb08] sm:$0xff] }
  0xcb   :  { %2131 = vmatpush3.msra.mxu1 %v408_v15  ;;  %2099 = vmatprep.subr.mxu0 %v390_v17  ;;  %v410_v15 = vld [vmem:[#allocation5 + $0xb80] sm:$0xff]  ;;  %v457_v17 = vld [vmem:[#allocation5 + $0xcf8] sm:$0xff] }
  0xcc   :  { %2132 = vmatprep.subr.mxu1 %v423_v18  ;;  %2100 = vmatpush3.msra.mxu0 %v374_v19  ;;  %v621_v18 = vrot.slane %v2427_v48, %v2398_v14  ;;  %v394_v19 = vld [vmem:[#allocation5 + $0xb00] sm:$0xff]  ;;  %v455_v14 = vld [vmem:[#allocation5 + $0xce8] sm:$0xff] }
  0xcd   :  { %2133 = vmatpush3.msra.mxu1 %v407_v20  ;;  %2101 = vmatprep.subr.mxu0 %v389_v21  ;;  %v617_v20 = vrot.slane %v2427_v48, %v2401_v16  ;;  %v441_v21 = vld [vmem:[#allocation5 + $0xc78] sm:$0xff]  ;;  %v454_v16 = vld [vmem:[#allocation5 + $0xce0] sm:$0xff]  ;;  %v487_v48 = vld [vmem:[#allocation5 + $0xde8] sm:$0xff] }
  0xce   :  { %2134 = vmatprep.subr.mxu1 %v422_v22  ;;  %2102 = vmatpush3.msra.mxu0 %v373_v47  ;;  %v456_v22 = vld [vmem:[#allocation5 + $0xcf0] sm:$0xff]  ;;  %v489_v47 = vld [vmem:[#allocation5 + $0xdf8] sm:$0xff] }
  0xcf   :  { %2135 = vmatpush3.msra.mxu1 %v406_v24  ;;  %2103 = vmatprep.subr.mxu0 %v388_v25  ;;  %v440_v24 = vld [vmem:[#allocation5 + $0xc70] sm:$0xff]  ;;  %v473_v25 = vld [vmem:[#allocation5 + $0xd78] sm:$0xff] }
  0xd0   :  { %2136 = vmatprep.subr.mxu1 %v421_v26  ;;  %2104 = vmatpush3.msra.mxu0 %v372_v27  ;;  %v488_v26 = vld [vmem:[#allocation5 + $0xdf0] sm:$0xff]  ;;  %v439_v27 = vld [vmem:[#allocation5 + $0xc68] sm:$0xff] }
  0xd1   :  { %2137 = vmatpush3.msra.mxu1 %v405_v28  ;;  %2105 = vmatprep.subr.mxu0 %v387_v29  ;;  %v472_v28 = vld [vmem:[#allocation5 + $0xd70] sm:$0xff]  ;;  %v438_v29 = vld [vmem:[#allocation5 + $0xc60] sm:$0xff] }
  0xd2   :  { %2138 = vmatprep.subr.mxu1 %v420_v30  ;;  %2106 = vmatpush3.msra.mxu0 %v371_v31  ;;  %v471_v30 = vld [vmem:[#allocation5 + $0xd68] sm:$0xff]  ;;  %v453_v31 = vld [vmem:[#allocation5 + $0xcd8] sm:$0xff] }
  0xd3   :  { %2139 = vmatpush3.msra.mxu1 %v404_v32  ;;  %2107 = vmatprep.subr.mxu0 %v386_v33  ;;  %v486_v32 = vld [vmem:[#allocation5 + $0xde0] sm:$0xff]  ;;  %v437_v33 = vld [vmem:[#allocation5 + $0xc58] sm:$0xff] }
  0xd4   :  { %2140 = vmatprep.subr.mxu1 %v419_v59  ;;  %2108 = vmatpush3.msra.mxu0 %v370_v34  ;;  %v470_v59 = vld [vmem:[#allocation5 + $0xd60] sm:$0xff]  ;;  %v452_v34 = vld [vmem:[#allocation5 + $0xcd0] sm:$0xff] }
  0xd5   :  { %2141 = vmatpush3.msra.mxu1 %v403_v35  ;;  %2109 = vmatprep.subr.mxu0 %v385_v36  ;;  %v485_v35 = vld [vmem:[#allocation5 + $0xdd8] sm:$0xff]  ;;  %v436_v36 = vld [vmem:[#allocation5 + $0xc50] sm:$0xff] }
  0xd6   :  { %2142 = vmatprep.subr.mxu1 %v418_v37  ;;  %2110 = vmatpush3.msra.mxu0 %v369_v38  ;;  %v469_v37 = vld [vmem:[#allocation5 + $0xd58] sm:$0xff]  ;;  %v451_v38 = vld [vmem:[#allocation5 + $0xcc8] sm:$0xff] }
  0xd7   :  { %2143 = vmatpush3.msra.mxu1 %v402_v39  ;;  %2111 = vmatprep.subr.mxu0 %v384_v40  ;;  %v484_v39 = vld [vmem:[#allocation5 + $0xdd0] sm:$0xff]  ;;  %v435_v40 = vld [vmem:[#allocation5 + $0xc48] sm:$0xff] }
  0xd8   :  { %2144 = vmatprep.subr.mxu1 %v417_v41  ;;  %2112 = vmatpush3.msra.mxu0 %v368_v42  ;;  %v468_v41 = vld [vmem:[#allocation5 + $0xd50] sm:$0xff]  ;;  %v450_v42 = vld [vmem:[#allocation5 + $0xcc0] sm:$0xff] }
  0xd9   :  { %2145 = vmatpush3.msra.mxu1 %v401_v43  ;;  %2113 = vmatprep.subr.mxu0 %v383_v44  ;;  %v483_v43 = vld [vmem:[#allocation5 + $0xdc8] sm:$0xff]  ;;  %v434_v44 = vld [vmem:[#allocation5 + $0xc40] sm:$0xff] }
  0xda   :  { %2146 = vmatprep.subr.mxu1 %v416_v45  ;;  %2114 = vmatpush3.msra.mxu0 %v367_v46  ;;  %v467_v45 = vld [vmem:[#allocation5 + $0xd48] sm:$0xff]  ;;  %v449_v46 = vld [vmem:[#allocation5 + $0xcb8] sm:$0xff] }
  0xdb   :  { %2147 = vmatpush3.msra.mxu1 %v400_v49  ;;  %2115 = vmatprep.subr.mxu0 %v382_v50  ;;  %v482_v49 = vld [vmem:[#allocation5 + $0xdc0] sm:$0xff]  ;;  %v433_v50 = vld [vmem:[#allocation5 + $0xc38] sm:$0xff] }
  0xdc   :  { %2148 = vmatprep.subr.mxu1 %v415_v51  ;;  %2116 = vmatpush3.msra.mxu0 %v366_v52  ;;  %v466_v51 = vld [vmem:[#allocation5 + $0xd40] sm:$0xff]  ;;  %v448_v52 = vld [vmem:[#allocation5 + $0xcb0] sm:$0xff] }
  0xdd   :  { %2149 = vmatpush3.msra.mxu1 %v399_v53  ;;  %2117 = vmatprep.subr.mxu0 %v381_v54  ;;  %v481_v53 = vld [vmem:[#allocation5 + $0xdb8] sm:$0xff]  ;;  %v432_v54 = vld [vmem:[#allocation5 + $0xc30] sm:$0xff] }
  0xde   :  { %2150 = vmatprep.subr.mxu1 %v414_v55  ;;  %2118 = vmatpush3.msra.mxu0 %v365_v57  ;;  %v465_v55 = vld [vmem:[#allocation5 + $0xd38] sm:$0xff]  ;;  %v447_v57 = vld [vmem:[#allocation5 + $0xca8] sm:$0xff] }
  0xdf   :  { %2151 = vmatpush3.msra.mxu1 %v398_v58  ;;  %2119 = vmatprep.subr.mxu0 %v380_v61  ;;  %v480_v58 = vld [vmem:[#allocation5 + $0xdb0] sm:$0xff]  ;;  %v431_v61 = vld [vmem:[#allocation5 + $0xc28] sm:$0xff] }
  0xe0   :  { %2152 = vmatprep.subr.mxu1 %v413_v62  ;;  %2120 = vmatpush3.msra.mxu0 %v364_v23  ;;  %v464_v62 = vld [vmem:[#allocation5 + $0xd30] sm:$0xff]  ;;  %v446_v23 = vld [vmem:[#allocation5 + $0xca0] sm:$0xff] }
  0xe1   :  { %2153 = vmatpush3.msra.mxu1 %v397_v1  ;;  %2121 = vmatprep.subr.mxu0 %v379_v2  ;;  %v479_v1 = vld [vmem:[#allocation5 + $0xda8] sm:$0xff]  ;;  %v430_v2 = vld [vmem:[#allocation5 + $0xc20] sm:$0xff] }
  0xe2   :  { %2154 = vmatprep.subr.mxu1 %v412_v4  ;;  %2122 = vmatpush3.msra.mxu0 %v363_v5  ;;  %v463_v4 = vld [vmem:[#allocation5 + $0xd28] sm:$0xff]  ;;  %v445_v5 = vld [vmem:[#allocation5 + $0xc98] sm:$0xff] }
  0xe3   :  { %2155 = vmatpush3.msra.mxu1 %v396_v6  ;;  %2123 = vmatprep.subr.mxu0 %v378_v7  ;;  %v478_v6 = vld [vmem:[#allocation5 + $0xda0] sm:$0xff]  ;;  %v429_v7 = vld [vmem:[#allocation5 + $0xc18] sm:$0xff] }
  0xe4   :  { %2156 = vmatprep.subr.mxu1 %v411_v8  ;;  %2124 = vmatpush3.msra.mxu0 %v362_v11  ;;  %v462_v8 = vld [vmem:[#allocation5 + $0xd20] sm:$0xff]  ;;  %v477_v11 = vld [vmem:[#allocation5 + $0xd98] sm:$0xff] }
  0xe5   :  { %1440 = vmatprep.mubr.f32.mxu0 %v613_v9  ;;  %2157 = vmatpush3.msra.mxu1 %v395_v13  ;;  %v444_v9 = vld [vmem:[#allocation5 + $0xc90] sm:$0xff]  ;;  %v461_v13 = vld [vmem:[#allocation5 + $0xd18] sm:$0xff] }
  0xe6   :  { %1441 = vmatmul.mubr.f32.vlgmr.msra.gmra.mxu0 %v609_v12  ;;  %2158 = vmatprep.subr.mxu1 %v410_v15  ;;  %v428_v12 = vld [vmem:[#allocation5 + $0xc10] sm:$0xff]  ;;  %v2445_v15 = vld [vmem:[#allocation2 + $0x18] sm:$0x3f] }
  0xe7   :  { %2163 = vmatprep.subr.mxu0 %v457_v17  ;;  %2159 = vmatpush3.msra.mxu1 %v394_v19  ;;  %v443_v17 = vld [vmem:[#allocation5 + $0xc88] sm:$0xff] }
  0xe8   :  { %1510 = vmatprep.mubr.f32.mxu1 %v621_v18  ;;  %2164 = vmatpush3.msra.mxu0 %v441_v21  ;;  %v476_v18 = vld [vmem:[#allocation5 + $0xd90] sm:$0xff]  ;;  %v427_v19 = vld [vmem:[#allocation5 + $0xc08] sm:$0xff]  ;;  %v442_v21 = vld [vmem:[#allocation5 + $0xc80] sm:$0xff] }
  0xe9   :  { %1511 = vmatmul.mubr.f32.vlgmr.msra.gmra.mxu1 %v617_v20  ;;  %2165 = vmatprep.subr.mxu0 %v456_v22  ;;  %v460_v20 = vld [vmem:[#allocation5 + $0xd10] sm:$0xff]  ;;  %v475_v22 = vld [vmem:[#allocation5 + $0xd88] sm:$0xff] }
  0xea   :  { %2198 = vmatprep.subr.mxu1 %v489_v47  ;;  %2166 = vmatpush3.msra.mxu0 %v440_v24  ;;  %v629_v47 = vrot.slane %v2445_v15, %v2368_v56  ;;  %v426_v24 = vld [vmem:[#allocation5 + $0xc00] sm:$0xff]  ;;  %v633_v56 = vrot.slane %v2445_v15, %v2379_v0 }
  0xeb   :  { %2199 = vmatpush3.msra.mxu1 %v473_v25  ;;  %2167 = vmatprep.subr.mxu0 %v455_v14  ;;  %v625_v25 = vrot.slane %v2445_v15, %v2376_v63  ;;  %v459_v14 = vld [vmem:[#allocation5 + $0xd08] sm:$0xff]  ;;  %v645_v63 = vrot.slane %v2445_v15, %v2390_v3  ;;  %v518_v0 = vld [vmem:[#allocation5 + $0xee0] sm:$0xff]  ;;  %v501_v3 = vld [vmem:[#allocation5 + $0xe58] sm:$0xff] }
  0xec   :  { %2200 = vmatprep.subr.mxu1 %v488_v26  ;;  %2168 = vmatpush3.msra.mxu0 %v439_v27  ;;  %v474_v26 = vld [vmem:[#allocation5 + $0xd80] sm:$0xff]  ;;  %v521_v27 = vld [vmem:[#allocation5 + $0xef8] sm:$0xff] }
  0xed   :  { %2201 = vmatpush3.msra.mxu1 %v472_v28  ;;  %2169 = vmatprep.subr.mxu0 %v454_v16  ;;  %v637_v28 = vrot.slane %v2445_v15, %v2373_v60  ;;  %v458_v16 = vld [vmem:[#allocation5 + $0xd00] sm:$0xff]  ;;  %v519_v60 = vld [vmem:[#allocation5 + $0xee8] sm:$0xff] }
  0xee   :  { %2202 = vmatprep.subr.mxu1 %v487_v48  ;;  %2170 = vmatpush3.msra.mxu0 %v438_v29  ;;  %v505_v48 = vld [vmem:[#allocation5 + $0xe78] sm:$0xff]  ;;  %v520_v29 = vld [vmem:[#allocation5 + $0xef0] sm:$0xff] }
  0xef   :  { %2203 = vmatpush3.msra.mxu1 %v471_v30  ;;  %2171 = vmatprep.subr.mxu0 %v453_v31  ;;  %v504_v30 = vld [vmem:[#allocation5 + $0xe70] sm:$0xff]  ;;  %v503_v31 = vld [vmem:[#allocation5 + $0xe68] sm:$0xff] }
  0xf0   :  { %2204 = vmatprep.subr.mxu1 %v486_v32  ;;  %2172 = vmatpush3.msra.mxu0 %v437_v33  ;;  %v502_v32 = vld [vmem:[#allocation5 + $0xe60] sm:$0xff]  ;;  %v517_v33 = vld [vmem:[#allocation5 + $0xed8] sm:$0xff] }
  0xf1   :  { %2205 = vmatpush3.msra.mxu1 %v470_v59  ;;  %2173 = vmatprep.subr.mxu0 %v452_v34  ;;  %v516_v59 = vld [vmem:[#allocation5 + $0xed0] sm:$0xff] }
  0xf2   :  { %2206 = vmatprep.subr.mxu1 %v485_v35  ;;  %2174 = vmatpush3.msra.mxu0 %v436_v36  ;;  %v500_v34 = vld [vmem:[#allocation5 + $0xe50] sm:$0xff]  ;;  %v515_v35 = vld [vmem:[#allocation5 + $0xec8] sm:$0xff] }
  0xf3   :  { %2207 = vmatpush3.msra.mxu1 %v469_v37  ;;  %2175 = vmatprep.subr.mxu0 %v451_v38  ;;  %v499_v36 = vld [vmem:[#allocation5 + $0xe48] sm:$0xff]  ;;  %v514_v37 = vld [vmem:[#allocation5 + $0xec0] sm:$0xff] }
  0xf4   :  { %2208 = vmatprep.subr.mxu1 %v484_v39  ;;  %2176 = vmatpush3.msra.mxu0 %v435_v40  ;;  %v498_v38 = vld [vmem:[#allocation5 + $0xe40] sm:$0xff]  ;;  %v513_v39 = vld [vmem:[#allocation5 + $0xeb8] sm:$0xff] }
  0xf5   :  { %2209 = vmatpush3.msra.mxu1 %v468_v41  ;;  %2177 = vmatprep.subr.mxu0 %v450_v42  ;;  %v497_v40 = vld [vmem:[#allocation5 + $0xe38] sm:$0xff]  ;;  %v512_v41 = vld [vmem:[#allocation5 + $0xeb0] sm:$0xff] }
  0xf6   :  { %2210 = vmatprep.subr.mxu1 %v483_v43  ;;  %2178 = vmatpush3.msra.mxu0 %v434_v44  ;;  %v496_v42 = vld [vmem:[#allocation5 + $0xe30] sm:$0xff]  ;;  %v511_v43 = vld [vmem:[#allocation5 + $0xea8] sm:$0xff] }
  0xf7   :  { %2211 = vmatpush3.msra.mxu1 %v467_v45  ;;  %2179 = vmatprep.subr.mxu0 %v449_v46  ;;  %v495_v44 = vld [vmem:[#allocation5 + $0xe28] sm:$0xff]  ;;  %v510_v45 = vld [vmem:[#allocation5 + $0xea0] sm:$0xff] }
  0xf8   :  { %2212 = vmatprep.subr.mxu1 %v482_v49  ;;  %2180 = vmatpush3.msra.mxu0 %v433_v50  ;;  %v494_v46 = vld [vmem:[#allocation5 + $0xe20] sm:$0xff]  ;;  %v509_v49 = vld [vmem:[#allocation5 + $0xe98] sm:$0xff] }
  0xf9   :  { %2213 = vmatpush3.msra.mxu1 %v466_v51  ;;  %2181 = vmatprep.subr.mxu0 %v448_v52  ;;  %v493_v50 = vld [vmem:[#allocation5 + $0xe18] sm:$0xff]  ;;  %v508_v51 = vld [vmem:[#allocation5 + $0xe90] sm:$0xff] }
  0xfa   :  { %2214 = vmatprep.subr.mxu1 %v481_v53  ;;  %2182 = vmatpush3.msra.mxu0 %v432_v54  ;;  %v492_v52 = vld [vmem:[#allocation5 + $0xe10] sm:$0xff]  ;;  %v507_v53 = vld [vmem:[#allocation5 + $0xe88] sm:$0xff] }
  0xfb   :  { %2215 = vmatpush3.msra.mxu1 %v465_v55  ;;  %2183 = vmatprep.subr.mxu0 %v447_v57  ;;  %v491_v54 = vld [vmem:[#allocation5 + $0xe08] sm:$0xff]  ;;  %v506_v55 = vld [vmem:[#allocation5 + $0xe80] sm:$0xff] }
  0xfc   :  { %2216 = vmatprep.subr.mxu1 %v480_v58  ;;  %2184 = vmatpush3.msra.mxu0 %v431_v61  ;;  %v490_v57 = vld [vmem:[#allocation5 + $0xe00] sm:$0xff]  ;;  %v641_v58 = vrot.slane %v2445_v15, %v2393_v10 }
  0xfd   :  { %2217 = vmatpush3.msra.mxu1 %v464_v62  ;;  %2185 = vmatprep.subr.mxu0 %v446_v23  ;;  %v1775_v61 = vpop.f32.mrf.mxu0 }
  0xfe   :  { %2218 = vmatprep.subr.mxu1 %v479_v1  ;;  %2186 = vmatpush3.msra.mxu0 %v430_v2  ;;  %v1810_v62 = vpop.f32.mrf.mxu1 }
  0xff   :  { %2219 = vmatpush3.msra.mxu1 %v463_v4  ;;  %2187 = vmatprep.subr.mxu0 %v445_v5  ;;  %v1776_v23 = vpop.f32.mrf.mxu0 }
 0x100   :  { %2220 = vmatprep.subr.mxu1 %v478_v6  ;;  %2188 = vmatpush3.msra.mxu0 %v429_v7  ;;  %v1811_v2 = vpop.f32.mrf.mxu1  ;;  %v1777_v6 = vadd.f32 %v1776_v23, %v1775_v61 }
 0x101   :  { %2221 = vmatpush3.msra.mxu1 %v462_v8  ;;  %2189 = vmatprep.subr.mxu0 %v444_v9  ;;  %v1812_v7 = vadd.f32 %v1811_v2, %v1810_v62 }
 0x102   :  { %2222 = vmatprep.subr.mxu1 %v477_v11  ;;  %2190 = vmatpush3.msra.mxu0 %v428_v12 }
 0x103   :  { %2223 = vmatpush3.msra.mxu1 %v461_v13  ;;  %2191 = vmatprep.subr.mxu0 %v443_v17  ;;  %v813_v12 = vadd.f32 %v1812_v7, %v1777_v6 }
 0x104   :  { %2224 = vmatprep.subr.mxu1 %v476_v18  ;;  %2192 = vmatpush3.msra.mxu0 %v427_v19 }
 0x105   :  { %2225 = vmatpush3.msra.mxu1 %v460_v20  ;;  %2193 = vmatprep.subr.mxu0 %v442_v21 }
 0x106   :  { %2226 = vmatprep.subr.mxu1 %v475_v22  ;;  %2194 = vmatpush3.msra.mxu0 %v426_v24 }
 0x107   :  { %1580 = vmatprep.mubr.f32.mxu0 %v629_v47  ;;  %2227 = vmatpush3.msra.mxu1 %v459_v14 }
 0x108   :  { %1581 = vmatmul.mubr.f32.vlgmr.msra.gmra.mxu0 %v625_v25  ;;  %2228 = vmatprep.subr.mxu1 %v474_v26 }
 0x109   :  { %2233 = vmatprep.subr.mxu0 %v521_v27  ;;  %2229 = vmatpush3.msra.mxu1 %v458_v16 }
 0x10a   :  { %1650 = vmatprep.mubr.f32.mxu1 %v637_v28  ;;  %2234 = vmatpush3.msra.mxu0 %v505_v48 }
 0x10b   :  { %1651 = vmatmul.mubr.f32.vlgmr.msra.gmra.mxu1 %v633_v56  ;;  %2235 = vmatprep.subr.mxu0 %v520_v29 }
 0x10c   :  { %1720 = vmatprep.mubr.f32.mxu0 %v645_v63  ;;  %2236 = vmatpush3.msra.mxu0 %v504_v30 }
 0x10d   :  { %2237 = vmatprep.subr.mxu0 %v519_v60 }
 0x10e   :  { %2238 = vmatpush3.msra.mxu0 %v503_v31 }
 0x10f   :  { %2239 = vmatprep.subr.mxu0 %v518_v0 }
 0x110   :  { %2240 = vmatpush3.msra.mxu0 %v502_v32 }
 0x111   :  { %2241 = vmatprep.subr.mxu0 %v517_v33 }
 0x112   :  { %2242 = vmatpush3.msra.mxu0 %v501_v3 }
 0x113   :  { %2243 = vmatprep.subr.mxu0 %v516_v59 }
 0x114   :  { %2244 = vmatpush3.msra.mxu0 %v500_v34 }
 0x115   :  { %2245 = vmatprep.subr.mxu0 %v515_v35 }
 0x116   :  { %2246 = vmatpush3.msra.mxu0 %v499_v36 }
 0x117   :  { %2247 = vmatprep.subr.mxu0 %v514_v37 }
 0x118   :  { %2248 = vmatpush3.msra.mxu0 %v498_v38 }
 0x119   :  { %2249 = vmatprep.subr.mxu0 %v513_v39 }
 0x11a   :  { %2250 = vmatpush3.msra.mxu0 %v497_v40 }
 0x11b   :  { %2251 = vmatprep.subr.mxu0 %v512_v41 }
 0x11c   :  { %2252 = vmatpush3.msra.mxu0 %v496_v42 }
 0x11d   :  { %2253 = vmatprep.subr.mxu0 %v511_v43 }
 0x11e   :  { %2254 = vmatpush3.msra.mxu0 %v495_v44  ;;  %v1845_v1 = vpop.f32.mrf.mxu0 }
 0x11f   :  { %2255 = vmatprep.subr.mxu0 %v510_v45 }
 0x120   :  { %2256 = vmatpush3.msra.mxu0 %v494_v46  ;;  %v1846_v4 = vpop.f32.mrf.mxu0 }
 0x121   :  { %2257 = vmatprep.subr.mxu0 %v509_v49  ;;  %v1880_v5 = vpop.f32.mrf.mxu1  ;;  %v1847_v9 = vadd.f32 %v1846_v4, %v1845_v1 }
 0x122   :  { %2258 = vmatpush3.msra.mxu0 %v493_v50 }
 0x123   :  { %2259 = vmatprep.subr.mxu0 %v508_v51  ;;  %v1881_v11 = vpop.f32.mrf.mxu1  ;;  %v883_v10 = vadd.f32 %v1847_v9, %v813_v12 }
 0x124   :  { %2260 = vmatpush3.msra.mxu0 %v492_v52  ;;  %v1882_v15 = vadd.f32 %v1881_v11, %v1880_v5 }
 0x125   :  { %2261 = vmatprep.subr.mxu0 %v507_v53 }
 0x126   :  { %2262 = vmatpush3.msra.mxu0 %v491_v54  ;;  %v953_v21 = vadd.f32 %v1882_v15, %v883_v10 }
 0x127   :  { %2263 = vmatprep.subr.mxu0 %v506_v55 }
 0x128   :  { %2264 = vmatpush3.msra.mxu0 %v490_v57 }
 0x129   :  { %1721 = vmatmul.mubr.f32.vlgmr.msra.gmra.mxu0 %v641_v58 }
 0x140   :  { %v1915_v8 = vpop.f32.mrf.mxu0 }
 0x142   :  { %v1916_v13 = vpop.f32.mrf.mxu0 }
 0x143   :  { %v1950_v17 = vpop.f32.mrf.mxu1  ;;  %v1917_v19 = vadd.f32 %v1916_v13, %v1915_v8 }
 0x145   :  { %v1951_v20 = vpop.f32.mrf.mxu1  ;;  %v1023_v24 = vadd.f32 %v1917_v19, %v953_v21 }
 0x146   :  { %v1952_v25 = vadd.f32 %v1951_v20, %v1950_v17 }
 0x148   :  { %v1093_v28 = vadd.f32 %v1952_v25, %v1023_v24 }
 0x162   :  { %v1985_v18 = vpop.f32.mrf.mxu0 }
 0x164   :  { %v1986_v22 = vpop.f32.mrf.mxu0 }
 0x165   :  { %v2020_v47 = vpop.f32.mrf.mxu1  ;;  %v1987_v26 = vadd.f32 %v1986_v22, %v1985_v18 }
 0x167   :  { %v2021_v27 = vpop.f32.mrf.mxu1  ;;  %v1163_v48 = vadd.f32 %v1987_v26, %v1093_v28 }
 0x168   :  { %v2022_v63 = vadd.f32 %v2021_v27, %v2020_v47 }
 0x16a   :  { %v1233_v31 = vadd.f32 %v2022_v63, %v1163_v48 }
 0x184   :  { %v2055_v14 = vpop.f32.mrf.mxu0 }
 0x186   :  { %v2056_v16 = vpop.f32.mrf.mxu0 }
 0x187   :  { %v2090_v56 = vpop.f32.mrf.mxu1  ;;  %v2057_v30 = vadd.f32 %v2056_v16, %v2055_v14 }
 0x189   :  { %v2091_v60 = vpop.f32.mrf.mxu1  ;;  %v1303_v33 = vadd.f32 %v2057_v30, %v1233_v31 }
 0x18a   :  { %v2092_v3 = vadd.f32 %v2091_v60, %v2090_v56 }
 0x18c   :  { %v1373_v36 = vadd.f32 %v2092_v3, %v1303_v33 }
 0x1a6   :  { %v2125_v29 = vpop.f32.mrf.mxu0 }
 0x1a8   :  { %v2126_v0 = vpop.f32.mrf.mxu0 }
 0x1a9   :  { %v2160_v32 = vpop.f32.mrf.mxu1  ;;  %v2127_v34 = vadd.f32 %v2126_v0, %v2125_v29 }
 0x1ab   :  { %v2161_v35 = vpop.f32.mrf.mxu1  ;;  %v1443_v39 = vadd.f32 %v2127_v34, %v1373_v36 }
 0x1ac   :  { %v2162_v40 = vadd.f32 %v2161_v35, %v2160_v32 }
 0x1ae   :  { %v1513_v43 = vadd.f32 %v2162_v40, %v1443_v39 }
 0x1c8   :  { %v2195_v59 = vpop.f32.mrf.mxu0 }
 0x1ca   :  { %v2196_v37 = vpop.f32.mrf.mxu0 }
 0x1cb   :  { %v2230_v38 = vpop.f32.mrf.mxu1  ;;  %v2197_v41 = vadd.f32 %v2196_v37, %v2195_v59 }
 0x1cd   :  { %v2231_v42 = vpop.f32.mrf.mxu1  ;;  %v1583_v44 = vadd.f32 %v2197_v41, %v1513_v43 }
 0x1ce   :  { %v2232_v45 = vadd.f32 %v2231_v42, %v2230_v38 }
 0x1d0   :  { %v1653_v50 = vadd.f32 %v2232_v45, %v1583_v44 }
 0x1e9   :  { %v2265_v46 = vpop.f32.mrf.mxu0 }
 0x1eb   :  { %v2266_v49 = vpop.f32.mrf.mxu0 }
 0x1ec   :  { %v2267_v51 = vadd.f32 %v2266_v49, %v2265_v46 }
 0x1ee   :  { %v1723_v52 = vadd.f32 %v2267_v51, %v1653_v50 }
 0x1f0   :  { %1726 = vst [vmem:[#allocation7] sm:$0x1] %v1723_v52 }
 0x1f1   :  { %2324 = shalt.err (!%p2321_p0)
}
 0x1f2   :  { %1736 = dma.vmem_to_hbm [thread:$0]  %s1734_s1, 16, %s2464_s2, [#allocation4]  }
 0x1f3   :  { %2337 = dma.done.wait [#allocation4], 16  }
 0x1f4   :  { %2338 = vsyncadd [#allocation4], 4294967280 }
 0x1f5   :  { %1740 = vsyncpa [#allocation3], 1 }
 0x1f6   :  { %1741 = vsyncpa [#allocation6], 1 }
 0x1f7   :  { %1742 = vsyncpa [#allocation4], 1 }

</bundles_post_ra>
